<compile_context>
chip_gen: v7x
topology: tpu7x:2x2x1
jax: 0.10.0
libtpu: 0.0.40
codegen_flags: <defaults>
</compile_context>

<pallas_src>
import jax
import jax.numpy as jnp
from jax import lax
from jax.experimental import pallas as pl
from jax.experimental.pallas import tpu as pltpu  # noqa: F401

LANES = 128                      # vreg / MXU lane width; all kernel outputs use it
M1, M1P = 196, 208               # conv1 pooled 14*14, padded to a multiple of 16
M2, M2P = 36, 40                 # conv2 pooled 6*6,  padded to a multiple of 8
K1P, K2P, KFP = 128, 256, 1536   # padded K dims (75 / 144 / 1296 real)


# ---------------- Pallas kernels ----------------

def _conv_relu_pool_kernel(cols_ref, w_ref, b_ref, o_ref):
    """Fused conv (im2col matmul) + bias + ReLU + 2x2 max-pool.

    cols_ref: (4*BM, K) bf16 -- pool-quadrant-major im2col rows: row g*BM + b*Mp + m is
              the patch whose conv output lands in pool-window position g = dy*2+dx of
              pooled pixel m of image b.
    w_ref:    (K, 128) bf16   conv weight (K and N zero-padded).
    b_ref:    (1, 128) f32    bias (zero-padded).
    o_ref:    (BM, 128) bf16  pooled/activated output, BM = B * padded pooled H*W.
    """
    bm = o_ref.shape[0]
    # Single concatenated-M MXU pass: RHS pushed to the weight registers once for all
    # images and all four pool quadrants.
    h = jnp.dot(cols_ref[...], w_ref[...], preferred_element_type=jnp.float32)
    # 2x2 max-pool == elementwise max over the four quadrant row-blocks (VPU has slack).
    best = jnp.maximum(jnp.maximum(h[0:bm], h[bm:2 * bm]),
                       jnp.maximum(h[2 * bm:3 * bm], h[3 * bm:4 * bm]))
    # Per-channel bias is quadrant-invariant and ReLU is monotonic, so bias + ReLU
    # after the max is exact.
    o_ref[...] = jnp.maximum(best + b_ref[...], 0.0).astype(o_ref.dtype)


def _fc_relu_fc_relu_kernel(x_ref, w1_ref, b1_ref, w2_ref, b2_ref, o_ref):
    # x: (Mp, 1536) bf16 ; w1: (1536,128) bf16 ; w2: (128,128) bf16 ; biases (1,128) f32
    h = jnp.dot(x_ref[...], w1_ref[...], preferred_element_type=jnp.float32)
    h = jnp.maximum(h + b1_ref[...], 0.0).astype(jnp.bfloat16)
    y = jnp.dot(h, w2_ref[...], preferred_element_type=jnp.float32)
    o_ref[...] = jnp.maximum(y + b2_ref[...], 0.0)   # module applies ReLU after fc2 too


# ---------------- wrappers ----------------

def _full_spec(shape):
    # whole-array block for a gridless call
    n = len(shape)
    return pl.BlockSpec(shape, lambda *_, n=n: (0,) * n)


def conv_relu_pool(cols, w, b, bm):
    # cols: (4*bm, K) bf16 ; w: (K, 128) bf16 ; b: (1, 128) f32 -> (bm, 128) bf16
    m4, K = cols.shape
    assert m4 == 4 * bm and w.shape == (K, LANES)
    cost = pl.CostEstimate(
        flops=2 * m4 * K * LANES, transcendentals=0,
        bytes_accessed=cols.size * 2 + w.size * 2 + b.size * 4 + bm * LANES * 2)
    return pl.pallas_call(
        _conv_relu_pool_kernel,
        out_shape=jax.ShapeDtypeStruct((bm, LANES), jnp.bfloat16),
        in_specs=[_full_spec(cols.shape), _full_spec(w.shape), _full_spec(b.shape)],
        out_specs=_full_spec((bm, LANES)),
        cost_estimate=cost,
    )(cols, w, b)


def fc_relu_fc_relu(x, w1, b1, w2, b2):
    Mp, K = x.shape
    cost = pl.CostEstimate(
        flops=2 * Mp * K * LANES + 2 * Mp * LANES * LANES, transcendentals=0,
        bytes_accessed=(x.size + w1.size + w2.size) * 2 + (b1.size + b2.size) * 4
        + Mp * LANES * 4)
    return pl.pallas_call(
        _fc_relu_fc_relu_kernel,
        out_shape=jax.ShapeDtypeStruct((Mp, LANES), jnp.float32),
        in_specs=[_full_spec(x.shape), _full_spec(w1.shape), _full_spec(b1.shape),
                  _full_spec(w2.shape), _full_spec(b2.shape)],
        out_specs=_full_spec((Mp, LANES)),
        cost_estimate=cost,
    )(x, w1, b1, w2, b2)


def im2col_pooled(x, kh, kw, m_pad, k_pad):
    """im2col for a VALID stride-1 conv, rows grouped by 2x2-max-pool quadrant.

    x: (B, H, W, C) NHWC.  Returns (4, B, m_pad, k_pad) with
      out[dy*2+dx, b, ph*Wp+pw, (i*kw+j)*C+c] = x[b, 2*ph+dy+i, 2*pw+dx+j, c]
    and the pooled-M / K tail zero-pads folded into a single pad op.
    """
    B, H, W, C = x.shape
    Ho, Wo = H - kh + 1, W - kw + 1
    Hp, Wp = Ho // 2, Wo // 2
    K = kh * kw * C
    patches = [x[:, i:i + Ho, j:j + Wo, :] for i in range(kh) for j in range(kw)]
    p = jnp.stack(patches, axis=3).reshape(B, Ho, Wo, K)
    p = p[:, :2 * Hp, :2 * Wp, :].reshape(B, Hp, 2, Wp, 2, K)
    p = jnp.transpose(p, (2, 4, 0, 1, 3, 5))            # (dy, dx, B, Hp, Wp, K)
    p = p.reshape(4, B, Hp * Wp, K)
    return jnp.pad(p, ((0, 0), (0, 0), (0, m_pad - Hp * Wp), (0, k_pad - K)))


# ---------------- parameters ----------------

def init_params(key):
    # PyTorch-layout parameters (Conv2d: OIHW, Linear: (out, in))
    ks = jax.random.split(key, 8)
    s = 0.05
    return {
        "conv1_w": s * jax.random.normal(ks[0], (16, 3, 5, 5), jnp.float32),
        "conv1_b": s * jax.random.normal(ks[1], (16,), jnp.float32),
        "conv2_w": s * jax.random.normal(ks[2], (36, 16, 3, 3), jnp.float32),
        "conv2_b": s * jax.random.normal(ks[3], (36,), jnp.float32),
        "fc1_w":   s * jax.random.normal(ks[4], (128, 36 * 6 * 6), jnp.float32),
        "fc1_b":   s * jax.random.normal(ks[5], (128,), jnp.float32),
        "fc2_w":   s * jax.random.normal(ks[6], (10, 128), jnp.float32),
        "fc2_b":   s * jax.random.normal(ks[7], (10,), jnp.float32),
    }


def prepare_params(p):
    """One-time conversion of PyTorch-layout params into de-padded bf16 kernel layouts."""
    f32, bf16 = jnp.float32, jnp.bfloat16
    # conv1 (OIHW 16,3,5,5) -> (K = 5*5*3 = 75, N = 16), padded to (128, 128)
    w1 = jnp.transpose(p["conv1_w"], (2, 3, 1, 0)).reshape(75, 16)
    w1 = jnp.pad(w1, ((0, K1P - 75), (0, LANES - 16))).astype(bf16)
    b1 = jnp.pad(p["conv1_b"], (0, LANES - 16)).reshape(1, LANES).astype(f32)
    # conv2 (OIHW 36,16,3,3) -> (K = 3*3*16 = 144, N = 36), padded to (256, 128)
    w2 = jnp.transpose(p["conv2_w"], (2, 3, 1, 0)).reshape(144, 36)
    w2 = jnp.pad(w2, ((0, K2P - 144), (0, LANES - 36))).astype(bf16)
    b2 = jnp.pad(p["conv2_b"], (0, LANES - 36)).reshape(1, LANES).astype(f32)
    # fc1: PyTorch flattens NCHW (idx = c*36 + h*6 + w); our activations flatten as
    # (h, w, c) over the 36 REAL channels -> fold the permutation into the weight.
    wf1 = jnp.transpose(p["fc1_w"].reshape(128, 36, 6, 6), (2, 3, 1, 0)).reshape(1296, 128)
    wf1 = jnp.pad(wf1, ((0, KFP - 1296), (0, 0))).astype(bf16)
    bf1 = p["fc1_b"].reshape(1, LANES).astype(f32)
    # fc2 (10,128) -> (128, N padded to 128); padded logits are relu(0) = 0, sliced later
    wf2 = jnp.pad(p["fc2_w"].T, ((0, 0), (0, LANES - 10))).astype(bf16)
    bf2 = jnp.pad(p["fc2_b"], (0, LANES - 10)).reshape(1, LANES).astype(f32)
    return {"conv1_w": w1, "conv1_b": b1, "conv2_w": w2, "conv2_b": b2,
            "fc1_w": wf1, "fc1_b": bf1, "fc2_w": wf2, "fc2_b": bf2}


# ---------------- forward ----------------

def cnn_forward(kp, x_nchw):
    # x_nchw: (B, 3, 32, 32) f32
    B = x_nchw.shape[0]
    x = jnp.transpose(x_nchw, (0, 2, 3, 1)).astype(jnp.bfloat16)        # NHWC (B,32,32,3)

    # stage 1: conv1(5x5, 3->16) + bias + ReLU + 2x2 pool
    cols1 = im2col_pooled(x, 5, 5, M1P, K1P).reshape(4 * B * M1P, K1P)  # (1664,128) @ B=2
    p1 = conv_relu_pool(cols1, kp["conv1_w"], kp["conv1_b"], bm=B * M1P)

    # de-pad to the 16 real channels before building stage 2's K (review #1)
    x2 = p1.reshape(B, M1P, LANES)[:, :M1, :16].reshape(B, 14, 14, 16)

    # stage 2: conv2(3x3, 16->36) + bias + ReLU + 2x2 pool ; K = 9*16 = 144 -> 256
    cols2 = im2col_pooled(x2, 3, 3, M2P, K2P).reshape(4 * B * M2P, K2P)
    p2 = conv_relu_pool(cols2, kp["conv2_w"], kp["conv2_b"], bm=B * M2P)

    # de-padded (h, w, c) flatten -> K = 36*36 = 1296 -> 1536 ; pad rows to a sublane tile
    flat = p2.reshape(B, M2P, LANES)[:, :M2, :36].reshape(B, M2 * 36)
    flat = jnp.pad(flat, ((0, (-B) % 8), (0, KFP - M2 * 36)))

    logits = fc_relu_fc_relu(flat, kp["fc1_w"], kp["fc1_b"], kp["fc2_w"], kp["fc2_b"])
    return logits[:B, :10]


# ---------------- pure-JAX reference (PyTorch semantics) ----------------

def reference_forward(p, x):
    y = lax.conv_general_dilated(x, p["conv1_w"], (1, 1), "VALID",
                                 dimension_numbers=("NCHW", "OIHW", "NCHW"))
    y = jax.nn.relu(y + p["conv1_b"][None, :, None, None])
    y = lax.reduce_window(y, -jnp.inf, lax.max, (1, 1, 2, 2), (1, 1, 2, 2), "VALID")
    y = lax.conv_general_dilated(y, p["conv2_w"], (1, 1), "VALID",
                                 dimension_numbers=("NCHW", "OIHW", "NCHW"))
    y = jax.nn.relu(y + p["conv2_b"][None, :, None, None])
    y = lax.reduce_window(y, -jnp.inf, lax.max, (1, 1, 2, 2), (1, 1, 2, 2), "VALID")
    y = y.reshape(y.shape[0], -1)                 # NCHW flatten, like x.view(-1, 1296)
    y = jax.nn.relu(y @ p["fc1_w"].T + p["fc1_b"])
    y = jax.nn.relu(y @ p["fc2_w"].T + p["fc2_b"])
    return y


if __name__ == "__main__":
    key = jax.random.PRNGKey(0)
    pkey, xkey = jax.random.split(key)
    params = init_params(pkey)
    kparams = prepare_params(params)              # one-time layout/pad/bf16 conversion
    # conv/fc dims require 32x32 spatial input (32->28->14->12->6); batch = 2
    x = jax.random.normal(xkey, (2, 3, 32, 32), jnp.float32)

    out = jax.block_until_ready(jax.jit(cnn_forward)(kparams, x))
    assert out.shape == (2, 10)

    ref = jax.block_until_ready(jax.jit(reference_forward)(params, x))
    err = float(jnp.max(jnp.abs(out - ref)))
    assert err < 0.1, f"mismatch vs reference: max abs err {err}"

    print("KERNEL_OK")
</pallas_src>

<mosaic_0001>
module attributes {stable_mosaic.version = 11 : i64} {
  func.func @_conv_relu_pool_kernel(%arg0: memref<1664x128xbf16, #tpu.memory_space<vmem>>, %arg1: memref<128x128xbf16, #tpu.memory_space<vmem>>, %arg2: memref<1x128xf32, #tpu.memory_space<vmem>>, %arg3: memref<416x128xbf16, #tpu.memory_space<vmem>>) attributes {dimension_semantics = [], scalar_prefetch = 0 : i64, scratch_operands = 0 : i64, tpu.core_type = #tpu.core_type<tc>} {
    %c0 = arith.constant 0 : index
    %c0_0 = arith.constant 0 : index
    %0 = vector.load %arg0[%c0, %c0_0] : memref<1664x128xbf16, #tpu.memory_space<vmem>>, vector<1664x128xbf16>
    %c0_1 = arith.constant 0 : index
    %c0_2 = arith.constant 0 : index
    %1 = vector.load %arg1[%c0_1, %c0_2] : memref<128x128xbf16, #tpu.memory_space<vmem>>, vector<128x128xbf16>
    %cst = arith.constant dense<0.000000e+00> : vector<1664x128xf32>
    %2 = tpu.matmul %0, %1, %cst {dimension_numbers = #tpu.dot_dimension_numbers<[1], [0], [0], [1], [0, 0, 1, 1], [], []>} : vector<1664x128xbf16>, vector<128x128xbf16>, vector<1664x128xf32> -> vector<1664x128xf32>
    %3 = vector.extract_strided_slice %2 {offsets = [0, 0], sizes = [416, 128], strides = [1, 1]} : vector<1664x128xf32> to vector<416x128xf32>
    %4 = vector.extract_strided_slice %2 {offsets = [416, 0], sizes = [416, 128], strides = [1, 1]} : vector<1664x128xf32> to vector<416x128xf32>
    %5 = arith.maximumf %3, %4 : vector<416x128xf32>
    %6 = vector.extract_strided_slice %2 {offsets = [832, 0], sizes = [416, 128], strides = [1, 1]} : vector<1664x128xf32> to vector<416x128xf32>
    %7 = vector.extract_strided_slice %2 {offsets = [1248, 0], sizes = [416, 128], strides = [1, 1]} : vector<1664x128xf32> to vector<416x128xf32>
    %8 = arith.maximumf %6, %7 : vector<416x128xf32>
    %9 = arith.maximumf %5, %8 : vector<416x128xf32>
    %c0_3 = arith.constant 0 : index
    %c0_4 = arith.constant 0 : index
    %10 = vector.load %arg2[%c0_3, %c0_4] : memref<1x128xf32, #tpu.memory_space<vmem>>, vector<1x128xf32>
    %11 = vector.broadcast %10 : vector<1x128xf32> to vector<416x128xf32>
    %12 = arith.addf %9, %11 : vector<416x128xf32>
    %cst_5 = arith.constant 0.000000e+00 : f32
    %13 = vector.broadcast %cst_5 : f32 to vector<416x128xf32>
    %14 = arith.maximumf %12, %13 : vector<416x128xf32>
    %15 = arith.truncf %14 : vector<416x128xf32> to vector<416x128xbf16>
    %c0_6 = arith.constant 0 : index
    %c0_7 = arith.constant 0 : index
    %16 = vector.load %arg3[%c0_6, %c0_7] : memref<416x128xbf16, #tpu.memory_space<vmem>>, vector<416x128xbf16>
    tpu.vector_store %arg3[%c0_6, %c0_7], %15 {strides = array<i32>} : memref<416x128xbf16, #tpu.memory_space<vmem>>, vector<416x128xbf16>,
    return
  }
}

module attributes {stable_mosaic.version = 11 : i64} {
  func.func @_conv_relu_pool_kernel(%arg0: memref<320x256xbf16, #tpu.memory_space<vmem>>, %arg1: memref<256x128xbf16, #tpu.memory_space<vmem>>, %arg2: memref<1x128xf32, #tpu.memory_space<vmem>>, %arg3: memref<80x128xbf16, #tpu.memory_space<vmem>>) attributes {dimension_semantics = [], scalar_prefetch = 0 : i64, scratch_operands = 0 : i64, tpu.core_type = #tpu.core_type<tc>} {
    %c0 = arith.constant 0 : index
    %c0_0 = arith.constant 0 : index
    %0 = vector.load %arg0[%c0, %c0_0] : memref<320x256xbf16, #tpu.memory_space<vmem>>, vector<320x256xbf16>
    %c0_1 = arith.constant 0 : index
    %c0_2 = arith.constant 0 : index
    %1 = vector.load %arg1[%c0_1, %c0_2] : memref<256x128xbf16, #tpu.memory_space<vmem>>, vector<256x128xbf16>
    %cst = arith.constant dense<0.000000e+00> : vector<320x128xf32>
    %2 = tpu.matmul %0, %1, %cst {dimension_numbers = #tpu.dot_dimension_numbers<[1], [0], [0], [1], [0, 0, 1, 1], [], []>} : vector<320x256xbf16>, vector<256x128xbf16>, vector<320x128xf32> -> vector<320x128xf32>
    %3 = vector.extract_strided_slice %2 {offsets = [0, 0], sizes = [80, 128], strides = [1, 1]} : vector<320x128xf32> to vector<80x128xf32>
    %4 = vector.extract_strided_slice %2 {offsets = [80, 0], sizes = [80, 128], strides = [1, 1]} : vector<320x128xf32> to vector<80x128xf32>
    %5 = arith.maximumf %3, %4 : vector<80x128xf32>
    %6 = vector.extract_strided_slice %2 {offsets = [160, 0], sizes = [80, 128], strides = [1, 1]} : vector<320x128xf32> to vector<80x128xf32>
    %7 = vector.extract_strided_slice %2 {offsets = [240, 0], sizes = [80, 128], strides = [1, 1]} : vector<320x128xf32> to vector<80x128xf32>
    %8 = arith.maximumf %6, %7 : vector<80x128xf32>
    %9 = arith.maximumf %5, %8 : vector<80x128xf32>
    %c0_3 = arith.constant 0 : index
    %c0_4 = arith.constant 0 : index
    %10 = vector.load %arg2[%c0_3, %c0_4] : memref<1x128xf32, #tpu.memory_space<vmem>>, vector<1x128xf32>
    %11 = vector.broadcast %10 : vector<1x128xf32> to vector<80x128xf32>
    %12 = arith.addf %9, %11 : vector<80x128xf32>
    %cst_5 = arith.constant 0.000000e+00 : f32
    %13 = vector.broadcast %cst_5 : f32 to vector<80x128xf32>
    %14 = arith.maximumf %12, %13 : vector<80x128xf32>
    %15 = arith.truncf %14 : vector<80x128xf32> to vector<80x128xbf16>
    %c0_6 = arith.constant 0 : index
    %c0_7 = arith.constant 0 : index
    %16 = vector.load %arg3[%c0_6, %c0_7] : memref<80x128xbf16, #tpu.memory_space<vmem>>, vector<80x128xbf16>
    tpu.vector_store %arg3[%c0_6, %c0_7], %15 {strides = array<i32>} : memref<80x128xbf16, #tpu.memory_space<vmem>>, vector<80x128xbf16>,
    return
  }
}

module attributes {stable_mosaic.version = 11 : i64} {
  func.func @_fc_relu_fc_relu_kernel(%arg0: memref<8x1536xbf16, #tpu.memory_space<vmem>>, %arg1: memref<1536x128xbf16, #tpu.memory_space<vmem>>, %arg2: memref<1x128xf32, #tpu.memory_space<vmem>>, %arg3: memref<128x128xbf16, #tpu.memory_space<vmem>>, %arg4: memref<1x128xf32, #tpu.memory_space<vmem>>, %arg5: memref<8x128xf32, #tpu.memory_space<vmem>>) attributes {dimension_semantics = [], scalar_prefetch = 0 : i64, scratch_operands = 0 : i64, tpu.core_type = #tpu.core_type<tc>} {
    %c0 = arith.constant 0 : index
    %c0_0 = arith.constant 0 : index
    %0 = vector.load %arg0[%c0, %c0_0] : memref<8x1536xbf16, #tpu.memory_space<vmem>>, vector<8x1536xbf16>
    %c0_1 = arith.constant 0 : index
    %c0_2 = arith.constant 0 : index
    %1 = vector.load %arg1[%c0_1, %c0_2] : memref<1536x128xbf16, #tpu.memory_space<vmem>>, vector<1536x128xbf16>
    %cst = arith.constant dense<0.000000e+00> : vector<8x128xf32>
    %2 = tpu.matmul %0, %1, %cst {dimension_numbers = #tpu.dot_dimension_numbers<[1], [0], [0], [1], [0, 0, 1, 1], [], []>} : vector<8x1536xbf16>, vector<1536x128xbf16>, vector<8x128xf32> -> vector<8x128xf32>
    %c0_3 = arith.constant 0 : index
    %c0_4 = arith.constant 0 : index
    %3 = vector.load %arg2[%c0_3, %c0_4] : memref<1x128xf32, #tpu.memory_space<vmem>>, vector<1x128xf32>
    %4 = vector.broadcast %3 : vector<1x128xf32> to vector<8x128xf32>
    %5 = arith.addf %2, %4 : vector<8x128xf32>
    %cst_5 = arith.constant 0.000000e+00 : f32
    %6 = vector.broadcast %cst_5 : f32 to vector<8x128xf32>
    %7 = arith.maximumf %5, %6 : vector<8x128xf32>
    %8 = arith.truncf %7 : vector<8x128xf32> to vector<8x128xbf16>
    %c0_6 = arith.constant 0 : index
    %c0_7 = arith.constant 0 : index
    %9 = vector.load %arg3[%c0_6, %c0_7] : memref<128x128xbf16, #tpu.memory_space<vmem>>, vector<128x128xbf16>
    %cst_8 = arith.constant dense<0.000000e+00> : vector<8x128xf32>
    %10 = tpu.matmul %8, %9, %cst_8 {dimension_numbers = #tpu.dot_dimension_numbers<[1], [0], [0], [1], [0, 0, 1, 1], [], []>} : vector<8x128xbf16>, vector<128x128xbf16>, vector<8x128xf32> -> vector<8x128xf32>
    %c0_9 = arith.constant 0 : index
    %c0_10 = arith.constant 0 : index
    %11 = vector.load %arg4[%c0_9, %c0_10] : memref<1x128xf32, #tpu.memory_space<vmem>>, vector<1x128xf32>
    %12 = vector.broadcast %11 : vector<1x128xf32> to vector<8x128xf32>
    %13 = arith.addf %10, %12 : vector<8x128xf32>
    %cst_11 = arith.constant 0.000000e+00 : f32
    %14 = vector.broadcast %cst_11 : f32 to vector<8x128xf32>
    %15 = arith.maximumf %13, %14 : vector<8x128xf32>
    %c0_12 = arith.constant 0 : index
    %c0_13 = arith.constant 0 : index
    %16 = vector.load %arg5[%c0_12, %c0_13] : memref<8x128xf32, #tpu.memory_space<vmem>>, vector<8x128xf32>
    tpu.vector_store %arg5[%c0_12, %c0_13], %15 {strides = array<i32>} : memref<8x128xf32, #tpu.memory_space<vmem>>, vector<8x128xf32>,
    return
  }
}

</mosaic_0001>

<bundles_post_ra>
// kernel: cnn_forward.3
= control target key start
LH: loop header
LB: loop body
LE: loop exit
PB: predicated region body
PF: predicated region fallthrough
CT: control target
= control target key end

     0   :  { %s3946_s1 = inlined_call_operand.vmem [shape: bf16[128,128], index: 1, kind: input, shape index: {}]   ;;  %s3947_s0 = inlined_call_operand.vmem [shape: bf16[1664,128], index: 0, kind: input, shape index: {}]   ;;  %s3948_s2 = inlined_call_operand.vmem [shape: f32[1,128], index: 2, kind: input, shape index: {}]   ;;  %s3949_s3 = inlined_call_operand.vmem [shape: bf16[416,128], index: 3, kind: output, shape index: {}]  }
   0x1   :  { %v3031_v0 = vld [vmem:[%s3946_s1] sm:$0xff]   ;;  %v3032_v1 = vld [vmem:[%s3946_s1 + $0x8] sm:$0xff]   ;;  %v3033_v2 = vld [vmem:[%s3946_s1 + $0x10] sm:$0xff]  }
   0x2   :  { %2791 = vmatprep.subr.bf16.mxu0 %v3031_v0  ;;  %3015 = vmatprep.subr.bf16.mxu1 %v3031_v0  ;;  %v3034_v3 = vld [vmem:[%s3946_s1 + $0x18] sm:$0xff]   ;;  %v3039_v4 = vld [vmem:[%s3947_s0] sm:$0xff]   ;;  %v3036_v7 = vld [vmem:[%s3946_s1 + $0x28] sm:$0xff]  }
   0x3   :  { %2792 = vmatpush3.bf16.msra.mxu0 %v3031_v0  ;;  %3023 = vmatpush3.bf16.msra.mxu1 %v3031_v0  ;;  %v3040_v5 = vld [vmem:[%s3947_s0 + $0x1a0] sm:$0xff]   ;;  %v3037_v8 = vld [vmem:[%s3946_s1 + $0x30] sm:$0xff]   ;;  %v3038_v9 = vld [vmem:[%s3946_s1 + $0x38] sm:$0xff]  }
   0x4   :  { %2793 = vmatprep.subr.bf16.mxu0 %v3032_v1  ;;  %3016 = vmatprep.subr.bf16.mxu1 %v3032_v1  ;;  %v3035_v6 = vld [vmem:[%s3946_s1 + $0x20] sm:$0xff]   ;;  %v3041_v10 = vld [vmem:[%s3947_s0 + $0x8] sm:$0xff]   ;;  %v3043_v12 = vld [vmem:[%s3947_s0 + $0x10] sm:$0xff]  }
   0x5   :  { %2807 = vmatprep.mubr.bf16.mxu0 %v3039_v4  ;;  %2911 = vmatprep.mubr.bf16.mxu1 %v3040_v5  ;;  %v3042_v11 = vld [vmem:[%s3947_s0 + $0x1a8] sm:$0xff]   ;;  %v3044_v13 = vld [vmem:[%s3947_s0 + $0x1b0] sm:$0xff]   ;;  %v3045_v14 = vld [vmem:[%s3947_s0 + $0x18] sm:$0xff]  }
   0x6   :  { %v3046_v15 = vld [vmem:[%s3947_s0 + $0x1b8] sm:$0xff]   ;;  %v3047_v16 = vld [vmem:[%s3947_s0 + $0x20] sm:$0xff]   ;;  %v3049_v18 = vld [vmem:[%s3947_s0 + $0x28] sm:$0xff]  }
   0x7   :  { %2794 = vmatpush3.bf16.msra.mxu0 %v3032_v1  ;;  %3024 = vmatpush3.bf16.msra.mxu1 %v3032_v1  ;;  %v3048_v17 = vld [vmem:[%s3947_s0 + $0x1c0] sm:$0xff]   ;;  %v3050_v19 = vld [vmem:[%s3947_s0 + $0x1c8] sm:$0xff]   ;;  %v3051_v20 = vld [vmem:[%s3947_s0 + $0x30] sm:$0xff]  }
   0x8   :  { %2795 = vmatprep.subr.bf16.mxu0 %v3033_v2  ;;  %3017 = vmatprep.subr.bf16.mxu1 %v3033_v2  ;;  %v3052_v21 = vld [vmem:[%s3947_s0 + $0x1d0] sm:$0xff]   ;;  %v3053_v22 = vld [vmem:[%s3947_s0 + $0x38] sm:$0xff]   ;;  %v3055_v24 = vld [vmem:[%s3947_s0 + $0x40] sm:$0xff]  }
   0x9   :  { %v3054_v23 = vld [vmem:[%s3947_s0 + $0x1d8] sm:$0xff]   ;;  %v3056_v25 = vld [vmem:[%s3947_s0 + $0x1e0] sm:$0xff]   ;;  %v3057_v26 = vld [vmem:[%s3947_s0 + $0x48] sm:$0xff]  }
   0xa   :  { %v3058_v27 = vld [vmem:[%s3947_s0 + $0x1e8] sm:$0xff]   ;;  %v3059_v28 = vld [vmem:[%s3947_s0 + $0x50] sm:$0xff]   ;;  %v3061_v30 = vld [vmem:[%s3947_s0 + $0x58] sm:$0xff]  }
   0xb   :  { %2796 = vmatpush3.bf16.msra.mxu0 %v3033_v2  ;;  %3025 = vmatpush3.bf16.msra.mxu1 %v3033_v2  ;;  %v3060_v29 = vld [vmem:[%s3947_s0 + $0x1f0] sm:$0xff]   ;;  %v3062_v31 = vld [vmem:[%s3947_s0 + $0x1f8] sm:$0xff]   ;;  %v3063_v32 = vld [vmem:[%s3947_s0 + $0x60] sm:$0xff]  }
   0xc   :  { %2797 = vmatprep.subr.bf16.mxu0 %v3034_v3  ;;  %3018 = vmatprep.subr.bf16.mxu1 %v3034_v3  ;;  %v3064_v33 = vld [vmem:[%s3947_s0 + $0x200] sm:$0xff]   ;;  %v3065_v34 = vld [vmem:[%s3947_s0 + $0x68] sm:$0xff]   ;;  %v3067_v36 = vld [vmem:[%s3947_s0 + $0x70] sm:$0xff]  }
   0xd   :  { %v3066_v35 = vld [vmem:[%s3947_s0 + $0x208] sm:$0xff]   ;;  %v3068_v37 = vld [vmem:[%s3947_s0 + $0x210] sm:$0xff]   ;;  %v3069_v38 = vld [vmem:[%s3947_s0 + $0x78] sm:$0xff]  }
   0xe   :  { %v3070_v39 = vld [vmem:[%s3947_s0 + $0x218] sm:$0xff]   ;;  %v3071_v40 = vld [vmem:[%s3947_s0 + $0x80] sm:$0xff]   ;;  %v3073_v42 = vld [vmem:[%s3947_s0 + $0x88] sm:$0xff]  }
   0xf   :  { %2798 = vmatpush3.bf16.msra.mxu0 %v3034_v3  ;;  %3026 = vmatpush3.bf16.msra.mxu1 %v3034_v3  ;;  %v3072_v41 = vld [vmem:[%s3947_s0 + $0x220] sm:$0xff]   ;;  %v3074_v43 = vld [vmem:[%s3947_s0 + $0x228] sm:$0xff]   ;;  %v3075_v44 = vld [vmem:[%s3947_s0 + $0x90] sm:$0xff]  }
  0x10   :  { %2799 = vmatprep.subr.bf16.mxu0 %v3035_v6  ;;  %3019 = vmatprep.subr.bf16.mxu1 %v3035_v6  ;;  %v3076_v45 = vld [vmem:[%s3947_s0 + $0x230] sm:$0xff]   ;;  %v3077_v46 = vld [vmem:[%s3947_s0 + $0x98] sm:$0xff]   ;;  %v3079_v48 = vld [vmem:[%s3947_s0 + $0xa0] sm:$0xff]  }
  0x11   :  { %v3078_v47 = vld [vmem:[%s3947_s0 + $0x238] sm:$0xff]   ;;  %v3080_v49 = vld [vmem:[%s3947_s0 + $0x240] sm:$0xff]   ;;  %v3081_v50 = vld [vmem:[%s3947_s0 + $0xa8] sm:$0xff]  }
  0x12   :  { %v3082_v51 = vld [vmem:[%s3947_s0 + $0x248] sm:$0xff]   ;;  %v3083_v52 = vld [vmem:[%s3947_s0 + $0xb0] sm:$0xff]   ;;  %v3085_v54 = vld [vmem:[%s3947_s0 + $0xb8] sm:$0xff]  }
  0x13   :  { %2800 = vmatpush3.bf16.msra.mxu0 %v3035_v6  ;;  %3027 = vmatpush3.bf16.msra.mxu1 %v3035_v6  ;;  %v3084_v53 = vld [vmem:[%s3947_s0 + $0x250] sm:$0xff]   ;;  %v3086_v55 = vld [vmem:[%s3947_s0 + $0x258] sm:$0xff]   ;;  %v3087_v56 = vld [vmem:[%s3947_s0 + $0xc0] sm:$0xff]  }
  0x14   :  { %2801 = vmatprep.subr.bf16.mxu0 %v3036_v7  ;;  %3020 = vmatprep.subr.bf16.mxu1 %v3036_v7  ;;  %v3088_v57 = vld [vmem:[%s3947_s0 + $0x260] sm:$0xff]   ;;  %v3089_v58 = vld [vmem:[%s3947_s0 + $0xc8] sm:$0xff]   ;;  %v3091_v60 = vld [vmem:[%s3947_s0 + $0xd0] sm:$0xff]  }
  0x15   :  { %v3090_v59 = vld [vmem:[%s3947_s0 + $0x268] sm:$0xff]   ;;  %v3092_v61 = vld [vmem:[%s3947_s0 + $0x270] sm:$0xff]   ;;  %v3093_v62 = vld [vmem:[%s3947_s0 + $0xd8] sm:$0xff]  }
  0x16   :  { %v3094_v63 = vld [vmem:[%s3947_s0 + $0x278] sm:$0xff]   ;;  %v3095_v0 = vld [vmem:[%s3947_s0 + $0xe0] sm:$0xff]   ;;  %v3097_v2 = vld [vmem:[%s3947_s0 + $0xe8] sm:$0xff]  }
  0x17   :  { %2802 = vmatpush3.bf16.msra.mxu0 %v3036_v7  ;;  %3028 = vmatpush3.bf16.msra.mxu1 %v3036_v7  ;;  %v3096_v1 = vld [vmem:[%s3947_s0 + $0x280] sm:$0xff]   ;;  %v3098_v3 = vld [vmem:[%s3947_s0 + $0x288] sm:$0xff]   ;;  %v3099_v4 = vld [vmem:[%s3947_s0 + $0xf0] sm:$0xff]  }
  0x18   :  { %2803 = vmatprep.subr.bf16.mxu0 %v3037_v8  ;;  %3021 = vmatprep.subr.bf16.mxu1 %v3037_v8  ;;  %v3100_v5 = vld [vmem:[%s3947_s0 + $0x290] sm:$0xff]   ;;  %v3101_v6 = vld [vmem:[%s3947_s0 + $0xf8] sm:$0xff]  }
  0x19   :  { %v3102_v7 = vld [vmem:[%s3947_s0 + $0x298] sm:$0xff]  }
  0x1b   :  { %2804 = vmatpush3.bf16.msra.mxu0 %v3037_v8  ;;  %3029 = vmatpush3.bf16.msra.mxu1 %v3037_v8  ;;  %v3103_v8 = vld [vmem:[%s3947_s0 + $0x100] sm:$0xff]  }
  0x1c   :  { %2805 = vmatprep.subr.bf16.mxu0 %v3038_v9  ;;  %3022 = vmatprep.subr.bf16.mxu1 %v3038_v9 }
  0x1f   :  { %2806 = vmatpush3.bf16.msra.mxu0 %v3038_v9  ;;  %3030 = vmatpush3.bf16.msra.mxu1 %v3038_v9  ;;  %v3104_v9 = vld [vmem:[%s3947_s0 + $0x2a0] sm:$0xff]  }
  0x22   :  { %2808 = vmatmul.mubr.bf16.vlgmr.msra.gmra.mrb[0].mxu0 %v3041_v10  ;;  %2912 = vmatmul.mubr.bf16.vlgmr.msra.gmra.mrb[0].mxu1 %v3042_v11  ;;  %v3105_v10 = vld [vmem:[%s3947_s0 + $0x108] sm:$0xff]  }
  0x23   :  { %2811 = vmatprep.mubr.bf16.mxu0 %v3043_v12  ;;  %2915 = vmatprep.mubr.bf16.mxu1 %v3044_v13  ;;  %v3106_v11 = vld [vmem:[%s3947_s0 + $0x2a8] sm:$0xff]   ;;  %v3107_v12 = vld [vmem:[%s3947_s0 + $0x110] sm:$0xff]  }
  0x24   :  { %v3108_v13 = vld [vmem:[%s3947_s0 + $0x2b0] sm:$0xff]  }
  0x2a   :  { %2812 = vmatmul.mubr.bf16.gmra.mrb[4].mxu0 %v3045_v14  ;;  %2916 = vmatmul.mubr.bf16.gmra.mrb[4].mxu1 %v3046_v15  ;;  %v3109_v14 = vld [vmem:[%s3947_s0 + $0x118] sm:$0xff]  }
  0x2b   :  { %2815 = vmatprep.mubr.bf16.mxu0 %v3047_v16  ;;  %2919 = vmatprep.mubr.bf16.mxu1 %v3048_v17  ;;  %v3110_v15 = vld [vmem:[%s3947_s0 + $0x2b8] sm:$0xff]   ;;  %v3111_v16 = vld [vmem:[%s3947_s0 + $0x120] sm:$0xff]  }
  0x2c   :  { %v3112_v17 = vld [vmem:[%s3947_s0 + $0x2c0] sm:$0xff]  }
  0x32   :  { %2816 = vmatmul.mubr.bf16.gmra.mrb[8].mxu0 %v3049_v18  ;;  %2920 = vmatmul.mubr.bf16.gmra.mrb[8].mxu1 %v3050_v19  ;;  %v3113_v18 = vld [vmem:[%s3947_s0 + $0x128] sm:$0xff]  }
  0x33   :  { %2819 = vmatprep.mubr.bf16.mxu0 %v3051_v20  ;;  %2923 = vmatprep.mubr.bf16.mxu1 %v3052_v21  ;;  %v3114_v19 = vld [vmem:[%s3947_s0 + $0x2c8] sm:$0xff]   ;;  %v3115_v20 = vld [vmem:[%s3947_s0 + $0x130] sm:$0xff]  }
  0x34   :  { %v3116_v21 = vld [vmem:[%s3947_s0 + $0x2d0] sm:$0xff]  }
  0x3a   :  { %2820 = vmatmul.mubr.bf16.gmra.mrb[12].mxu0 %v3053_v22  ;;  %2924 = vmatmul.mubr.bf16.gmra.mrb[12].mxu1 %v3054_v23  ;;  %v3117_v22 = vld [vmem:[%s3947_s0 + $0x138] sm:$0xff]  }
  0x3b   :  { %2823 = vmatprep.mubr.bf16.mxu0 %v3055_v24  ;;  %2927 = vmatprep.mubr.bf16.mxu1 %v3056_v25  ;;  %v3118_v23 = vld [vmem:[%s3947_s0 + $0x2d8] sm:$0xff]   ;;  %v3119_v24 = vld [vmem:[%s3947_s0 + $0x140] sm:$0xff]  }
  0x3c   :  { %v3120_v25 = vld [vmem:[%s3947_s0 + $0x2e0] sm:$0xff]  }
  0x42   :  { %2824 = vmatmul.mubr.bf16.gmra.mrb[16].mxu0 %v3057_v26  ;;  %2928 = vmatmul.mubr.bf16.gmra.mrb[16].mxu1 %v3058_v27  ;;  %v3121_v26 = vld [vmem:[%s3947_s0 + $0x148] sm:$0xff]  }
  0x43   :  { %2827 = vmatprep.mubr.bf16.mxu0 %v3059_v28  ;;  %2931 = vmatprep.mubr.bf16.mxu1 %v3060_v29  ;;  %v3122_v27 = vld [vmem:[%s3947_s0 + $0x2e8] sm:$0xff]   ;;  %v3123_v28 = vld [vmem:[%s3947_s0 + $0x150] sm:$0xff]  }
  0x44   :  { %v3124_v29 = vld [vmem:[%s3947_s0 + $0x2f0] sm:$0xff]  }
  0x4a   :  { %2828 = vmatmul.mubr.bf16.gmra.mrb[20].mxu0 %v3061_v30  ;;  %2932 = vmatmul.mubr.bf16.gmra.mrb[20].mxu1 %v3062_v31  ;;  %v3125_v30 = vld [vmem:[%s3947_s0 + $0x158] sm:$0xff]  }
  0x4b   :  { %2831 = vmatprep.mubr.bf16.mxu0 %v3063_v32  ;;  %2935 = vmatprep.mubr.bf16.mxu1 %v3064_v33  ;;  %v3126_v31 = vld [vmem:[%s3947_s0 + $0x2f8] sm:$0xff]   ;;  %v3127_v32 = vld [vmem:[%s3947_s0 + $0x160] sm:$0xff]  }
  0x4c   :  { %v3128_v33 = vld [vmem:[%s3947_s0 + $0x300] sm:$0xff]  }
  0x52   :  { %2832 = vmatmul.mubr.bf16.gmra.mrb[24].mxu0 %v3065_v34  ;;  %2936 = vmatmul.mubr.bf16.gmra.mrb[24].mxu1 %v3066_v35  ;;  %v3129_v34 = vld [vmem:[%s3947_s0 + $0x168] sm:$0xff]  }
  0x53   :  { %2835 = vmatprep.mubr.bf16.mxu0 %v3067_v36  ;;  %2939 = vmatprep.mubr.bf16.mxu1 %v3068_v37  ;;  %v3130_v35 = vld [vmem:[%s3947_s0 + $0x308] sm:$0xff]   ;;  %v3131_v36 = vld [vmem:[%s3947_s0 + $0x170] sm:$0xff]  }
  0x54   :  { %v3132_v37 = vld [vmem:[%s3947_s0 + $0x310] sm:$0xff]  }
  0x5a   :  { %2836 = vmatmul.mubr.bf16.gmra.mrb[28].mxu0 %v3069_v38  ;;  %2940 = vmatmul.mubr.bf16.gmra.mrb[28].mxu1 %v3070_v39  ;;  %v3133_v38 = vld [vmem:[%s3947_s0 + $0x178] sm:$0xff]  }
  0x5b   :  { %2839 = vmatprep.mubr.bf16.mxu0 %v3071_v40  ;;  %2943 = vmatprep.mubr.bf16.mxu1 %v3072_v41  ;;  %v3134_v39 = vld [vmem:[%s3947_s0 + $0x318] sm:$0xff]   ;;  %v3135_v40 = vld [vmem:[%s3947_s0 + $0x180] sm:$0xff]  }
  0x5c   :  { %v3136_v41 = vld [vmem:[%s3947_s0 + $0x320] sm:$0xff]  }
  0x62   :  { %2840 = vmatmul.mubr.bf16.gmra.mrb[32].mxu0 %v3073_v42  ;;  %2944 = vmatmul.mubr.bf16.gmra.mrb[32].mxu1 %v3074_v43  ;;  %v3137_v42 = vld [vmem:[%s3947_s0 + $0x188] sm:$0xff]  }
  0x63   :  { %2843 = vmatprep.mubr.bf16.mxu0 %v3075_v44  ;;  %2947 = vmatprep.mubr.bf16.mxu1 %v3076_v45  ;;  %v3138_v43 = vld [vmem:[%s3947_s0 + $0x328] sm:$0xff]   ;;  %v3139_v44 = vld [vmem:[%s3947_s0 + $0x190] sm:$0xff]  }
  0x64   :  { %v3140_v45 = vld [vmem:[%s3947_s0 + $0x330] sm:$0xff]  }
  0x6a   :  { %2844 = vmatmul.mubr.bf16.gmra.mrb[36].mxu0 %v3077_v46  ;;  %2948 = vmatmul.mubr.bf16.gmra.mrb[36].mxu1 %v3078_v47  ;;  %v3141_v46 = vld [vmem:[%s3947_s0 + $0x198] sm:$0xff]  }
  0x6b   :  { %2847 = vmatprep.mubr.bf16.mxu0 %v3079_v48  ;;  %2951 = vmatprep.mubr.bf16.mxu1 %v3080_v49  ;;  %v3142_v47 = vld [vmem:[%s3947_s0 + $0x338] sm:$0xff]  }
  0x72   :  { %2848 = vmatmul.mubr.bf16.gmra.mrb[40].mxu0 %v3081_v50  ;;  %2952 = vmatmul.mubr.bf16.gmra.mrb[40].mxu1 %v3082_v51 }
  0x73   :  { %2851 = vmatprep.mubr.bf16.mxu0 %v3083_v52  ;;  %2955 = vmatprep.mubr.bf16.mxu1 %v3084_v53 }
  0x7a   :  { %2852 = vmatmul.mubr.bf16.gmra.mrb[44].mxu0 %v3085_v54  ;;  %2956 = vmatmul.mubr.bf16.gmra.mrb[44].mxu1 %v3086_v55 }
  0x7b   :  { %2855 = vmatprep.mubr.bf16.mxu0 %v3087_v56  ;;  %2959 = vmatprep.mubr.bf16.mxu1 %v3088_v57 }
  0x82   :  { %2856 = vmatmul.mubr.bf16.gmra.mrb[48].mxu0 %v3089_v58  ;;  %2960 = vmatmul.mubr.bf16.gmra.mrb[48].mxu1 %v3090_v59 }
  0x83   :  { %2859 = vmatprep.mubr.bf16.mxu0 %v3091_v60  ;;  %2963 = vmatprep.mubr.bf16.mxu1 %v3092_v61 }
  0x8a   :  { %2860 = vmatmul.mubr.bf16.gmra.mrb[52].mxu0 %v3093_v62  ;;  %2964 = vmatmul.mubr.bf16.gmra.mrb[52].mxu1 %v3094_v63 }
  0x8b   :  { %2863 = vmatprep.mubr.bf16.mxu0 %v3095_v0  ;;  %2967 = vmatprep.mubr.bf16.mxu1 %v3096_v1 }
  0x92   :  { %2864 = vmatmul.mubr.bf16.gmra.mrb[56].mxu0 %v3097_v2  ;;  %2968 = vmatmul.mubr.bf16.gmra.mrb[56].mxu1 %v3098_v3 }
  0x93   :  { %2867 = vmatprep.mubr.bf16.mxu0 %v3099_v4  ;;  %2971 = vmatprep.mubr.bf16.mxu1 %v3100_v5 }
  0x9a   :  { %2868 = vmatmul.mubr.bf16.gmra.mrb[60].mxu0 %v3101_v6  ;;  %2972 = vmatmul.mubr.bf16.gmra.mrb[60].mxu1 %v3102_v7 }
  0x9b   :  { %2871 = vmatprep.mubr.bf16.mxu0 %v3103_v8  ;;  %2975 = vmatprep.mubr.bf16.mxu1 %v3104_v9 }
  0xa2   :  { %2872 = vmatmul.mubr.bf16.gmra.mrb[64].mxu0 %v3105_v10  ;;  %2976 = vmatmul.mubr.bf16.gmra.mrb[64].mxu1 %v3106_v11 }
  0xa3   :  { %2875 = vmatprep.mubr.bf16.mxu0 %v3107_v12  ;;  %2979 = vmatprep.mubr.bf16.mxu1 %v3108_v13 }
  0xaa   :  { %2876 = vmatmul.mubr.bf16.gmra.mrb[68].mxu0 %v3109_v14  ;;  %2980 = vmatmul.mubr.bf16.gmra.mrb[68].mxu1 %v3110_v15 }
  0xab   :  { %2879 = vmatprep.mubr.bf16.mxu0 %v3111_v16  ;;  %2983 = vmatprep.mubr.bf16.mxu1 %v3112_v17 }
  0xb2   :  { %2880 = vmatmul.mubr.bf16.gmra.mrb[72].mxu0 %v3113_v18  ;;  %2984 = vmatmul.mubr.bf16.gmra.mrb[72].mxu1 %v3114_v19 }
  0xb3   :  { %2883 = vmatprep.mubr.bf16.mxu0 %v3115_v20  ;;  %2987 = vmatprep.mubr.bf16.mxu1 %v3116_v21 }
  0xba   :  { %2884 = vmatmul.mubr.bf16.gmra.mrb[76].mxu0 %v3117_v22  ;;  %2988 = vmatmul.mubr.bf16.gmra.mrb[76].mxu1 %v3118_v23 }
  0xbb   :  { %2887 = vmatprep.mubr.bf16.mxu0 %v3119_v24  ;;  %2991 = vmatprep.mubr.bf16.mxu1 %v3120_v25 }
  0xc2   :  { %2888 = vmatmul.mubr.bf16.gmra.mrb[80].mxu0 %v3121_v26  ;;  %2992 = vmatmul.mubr.bf16.gmra.mrb[80].mxu1 %v3122_v27 }
  0xc3   :  { %2891 = vmatprep.mubr.bf16.mxu0 %v3123_v28  ;;  %2995 = vmatprep.mubr.bf16.mxu1 %v3124_v29 }
  0xca   :  { %2892 = vmatmul.mubr.bf16.gmra.mrb[84].mxu0 %v3125_v30  ;;  %2996 = vmatmul.mubr.bf16.gmra.mrb[84].mxu1 %v3126_v31 }
  0xcb   :  { %2895 = vmatprep.mubr.bf16.mxu0 %v3127_v32  ;;  %2999 = vmatprep.mubr.bf16.mxu1 %v3128_v33 }
  0xd2   :  { %2896 = vmatmul.mubr.bf16.gmra.mrb[88].mxu0 %v3129_v34  ;;  %3000 = vmatmul.mubr.bf16.gmra.mrb[88].mxu1 %v3130_v35 }
  0xd3   :  { %2899 = vmatprep.mubr.bf16.mxu0 %v3131_v36  ;;  %3003 = vmatprep.mubr.bf16.mxu1 %v3132_v37 }
  0xda   :  { %2900 = vmatmul.mubr.bf16.gmra.mrb[92].mxu0 %v3133_v38  ;;  %3004 = vmatmul.mubr.bf16.gmra.mrb[92].mxu1 %v3134_v39 }
  0xdb   :  { %2903 = vmatprep.mubr.bf16.mxu0 %v3135_v40  ;;  %3007 = vmatprep.mubr.bf16.mxu1 %v3136_v41 }
  0xe2   :  { %2904 = vmatmul.mubr.bf16.gmra.mrb[96].mxu0 %v3137_v42  ;;  %3008 = vmatmul.mubr.bf16.gmra.mrb[96].mxu1 %v3138_v43 }
  0xe3   :  { %2907 = vmatprep.mubr.bf16.mxu0 %v3139_v44  ;;  %3011 = vmatprep.mubr.bf16.mxu1 %v3140_v45 }
  0xea   :  { %2908 = vmatmul.mubr.bf16.gmra.mrb[100].mxu0 %v3141_v46  ;;  %3012 = vmatmul.mubr.bf16.gmra.mrb[100].mxu1 %v3142_v47 }
  0xf5   :  { %v3499_v48 = vpop.f32.mrb[0].mxu0  ;;  %v3501_v49 = vpop.f32.mrb[0].mxu1 }
  0xf6   :  { %v3503_v50 = vpop.f32.mrb[1].mxu0  ;;  %v3505_v51 = vpop.f32.mrb[1].mxu1 }
  0xf7   :  { %v3507_v52 = vpop.f32.mrb[2].mxu0  ;;  %v3509_v53 = vpop.f32.mrb[2].mxu1 }
  0xf8   :  { %v3511_v54 = vpop.f32.mrb[3].mxu0  ;;  %v3513_v55 = vpop.f32.mrb[3].mxu1 }
  0xfd   :  { %v3515_v56 = vpop.f32.mrb[4].mxu0  ;;  %v3517_v57 = vpop.f32.mrb[4].mxu1 }
  0xfe   :  { %v3519_v58 = vpop.f32.mrb[5].mxu0  ;;  %v3521_v59 = vpop.f32.mrb[5].mxu1 }
  0xff   :  { %v3523_v60 = vpop.f32.mrb[6].mxu0  ;;  %v3525_v61 = vpop.f32.mrb[6].mxu1 }
 0x100   :  { %v3527_v62 = vpop.f32.mrb[7].mxu0  ;;  %v3529_v63 = vpop.f32.mrb[7].mxu1 }
 0x105   :  { %v3531_v0 = vpop.f32.mrb[8].mxu0  ;;  %v3533_v1 = vpop.f32.mrb[8].mxu1 }
 0x106   :  { %v3535_v2 = vpop.f32.mrb[9].mxu0  ;;  %v3537_v3 = vpop.f32.mrb[9].mxu1 }
 0x107   :  { %v3539_v4 = vpop.f32.mrb[10].mxu0  ;;  %v3541_v5 = vpop.f32.mrb[10].mxu1 }
 0x108   :  { %v3543_v6 = vpop.f32.mrb[11].mxu0  ;;  %v3545_v7 = vpop.f32.mrb[11].mxu1 }
 0x10d   :  { %v3547_v8 = vpop.f32.mrb[12].mxu0  ;;  %v3549_v9 = vpop.f32.mrb[12].mxu1 }
 0x10e   :  { %v3551_v10 = vpop.f32.mrb[13].mxu0  ;;  %v3553_v11 = vpop.f32.mrb[13].mxu1 }
 0x10f   :  { %v3555_v12 = vpop.f32.mrb[14].mxu0  ;;  %v3557_v13 = vpop.f32.mrb[14].mxu1 }
 0x110   :  { %v3559_v14 = vpop.f32.mrb[15].mxu0  ;;  %v3561_v15 = vpop.f32.mrb[15].mxu1 }
 0x115   :  { %v3563_v16 = vpop.f32.mrb[16].mxu0  ;;  %v3565_v17 = vpop.f32.mrb[16].mxu1 }
 0x116   :  { %v3567_v18 = vpop.f32.mrb[17].mxu0  ;;  %v3569_v19 = vpop.f32.mrb[17].mxu1 }
 0x117   :  { %v3571_v20 = vpop.f32.mrb[18].mxu0  ;;  %v3573_v21 = vpop.f32.mrb[18].mxu1 }
 0x118   :  { %v3575_v22 = vpop.f32.mrb[19].mxu0  ;;  %v3577_v23 = vpop.f32.mrb[19].mxu1 }
 0x11d   :  { %v3579_v24 = vpop.f32.mrb[20].mxu0  ;;  %v3581_v25 = vpop.f32.mrb[20].mxu1 }
 0x11e   :  { %v3583_v26 = vpop.f32.mrb[21].mxu0  ;;  %v3585_v27 = vpop.f32.mrb[21].mxu1 }
 0x11f   :  { %v3587_v28 = vpop.f32.mrb[22].mxu0  ;;  %v3589_v29 = vpop.f32.mrb[22].mxu1 }
 0x120   :  { %v3591_v30 = vpop.f32.mrb[23].mxu0  ;;  %v3593_v31 = vpop.f32.mrb[23].mxu1 }
 0x121   :  { %3950 = vst [vmem:[#allocation2_spill] sm:$0xff] %v3593_v31 }
 0x125   :  { %v3595_v32 = vpop.f32.mrb[24].mxu0  ;;  %v3597_v33 = vpop.f32.mrb[24].mxu1 }
 0x126   :  { %3951 = vst [vmem:[#allocation3_spill] sm:$0xff] %v3595_v32  ;;  %3952 = vst [vmem:[#allocation4_spill] sm:$0xff] %v3597_v33  ;;  %v3599_v34 = vpop.f32.mrb[25].mxu0  ;;  %v3601_v35 = vpop.f32.mrb[25].mxu1 }
 0x127   :  { %3953 = vst [vmem:[#allocation5_spill] sm:$0xff] %v3599_v34  ;;  %3954 = vst [vmem:[#allocation6_spill] sm:$0xff] %v3601_v35  ;;  %v3603_v36 = vpop.f32.mrb[26].mxu0  ;;  %v3605_v37 = vpop.f32.mrb[26].mxu1 }
 0x128   :  { %3955 = vst [vmem:[#allocation7_spill] sm:$0xff] %v3603_v36  ;;  %3956 = vst [vmem:[#allocation8_spill] sm:$0xff] %v3605_v37  ;;  %v3607_v38 = vpop.f32.mrb[27].mxu0  ;;  %v3609_v39 = vpop.f32.mrb[27].mxu1 }
 0x129   :  { %3957 = vst [vmem:[#allocation9_spill] sm:$0xff] %v3607_v38  ;;  %3958 = vst [vmem:[#allocation10_spill] sm:$0xff] %v3609_v39 }
 0x12d   :  { %v3611_v40 = vpop.f32.mrb[28].mxu0  ;;  %v3613_v41 = vpop.f32.mrb[28].mxu1 }
 0x12e   :  { %3959 = vst [vmem:[#allocation11_spill] sm:$0xff] %v3611_v40  ;;  %3960 = vst [vmem:[#allocation12_spill] sm:$0xff] %v3613_v41  ;;  %v3615_v42 = vpop.f32.mrb[29].mxu0  ;;  %v3617_v43 = vpop.f32.mrb[29].mxu1 }
 0x12f   :  { %3961 = vst [vmem:[#allocation13_spill] sm:$0xff] %v3615_v42  ;;  %3962 = vst [vmem:[#allocation14_spill] sm:$0xff] %v3617_v43  ;;  %v3619_v44 = vpop.f32.mrb[30].mxu0  ;;  %v3621_v45 = vpop.f32.mrb[30].mxu1 }
 0x130   :  { %3963 = vst [vmem:[#allocation15_spill] sm:$0xff] %v3619_v44  ;;  %3964 = vst [vmem:[#allocation16_spill] sm:$0xff] %v3621_v45  ;;  %v3623_v46 = vpop.f32.mrb[31].mxu0  ;;  %v3625_v47 = vpop.f32.mrb[31].mxu1 }
 0x131   :  { %3965 = vst [vmem:[#allocation17_spill] sm:$0xff] %v3623_v46  ;;  %3966 = vst [vmem:[#allocation18_spill] sm:$0xff] %v3625_v47 }
 0x135   :  { %v3627_v37 = vpop.f32.mrb[32].mxu0  ;;  %v3629_v38 = vpop.f32.mrb[32].mxu1 }
 0x136   :  { %3967 = vst [vmem:[#allocation19_spill] sm:$0xff] %v3627_v37  ;;  %3968 = vst [vmem:[#allocation20_spill] sm:$0xff] %v3629_v38  ;;  %v3631_v39 = vpop.f32.mrb[33].mxu0  ;;  %v3633_v40 = vpop.f32.mrb[33].mxu1 }
 0x137   :  { %3969 = vst [vmem:[#allocation21_spill] sm:$0xff] %v3631_v39  ;;  %3970 = vst [vmem:[#allocation22_spill] sm:$0xff] %v3633_v40  ;;  %v3635_v41 = vpop.f32.mrb[34].mxu0  ;;  %v3637_v42 = vpop.f32.mrb[34].mxu1 }
 0x138   :  { %3971 = vst [vmem:[#allocation23_spill] sm:$0xff] %v3635_v41  ;;  %3972 = vst [vmem:[#allocation24_spill] sm:$0xff] %v3637_v42  ;;  %v3639_v43 = vpop.f32.mrb[35].mxu0  ;;  %v3641_v44 = vpop.f32.mrb[35].mxu1 }
 0x139   :  { %3973 = vst [vmem:[#allocation25_spill] sm:$0xff] %v3639_v43  ;;  %3974 = vst [vmem:[#allocation26_spill] sm:$0xff] %v3641_v44 }
 0x13d   :  { %v3643_v45 = vpop.f32.mrb[36].mxu0  ;;  %v3645_v46 = vpop.f32.mrb[36].mxu1 }
 0x13e   :  { %3975 = vst [vmem:[#allocation27_spill] sm:$0xff] %v3643_v45  ;;  %3976 = vst [vmem:[#allocation28_spill] sm:$0xff] %v3645_v46  ;;  %v3647_v47 = vpop.f32.mrb[37].mxu0  ;;  %v3649_v37 = vpop.f32.mrb[37].mxu1 }
 0x13f   :  { %3977 = vst [vmem:[#allocation29_spill] sm:$0xff] %v3647_v47  ;;  %3978 = vst [vmem:[#allocation30_spill] sm:$0xff] %v3649_v37  ;;  %v3651_v38 = vpop.f32.mrb[38].mxu0  ;;  %v3653_v39 = vpop.f32.mrb[38].mxu1 }
 0x140   :  { %3979 = vst [vmem:[#allocation31_spill] sm:$0xff] %v3651_v38  ;;  %3980 = vst [vmem:[#allocation32_spill] sm:$0xff] %v3653_v39  ;;  %v3655_v40 = vpop.f32.mrb[39].mxu0  ;;  %v3657_v41 = vpop.f32.mrb[39].mxu1 }
 0x141   :  { %3981 = vst [vmem:[#allocation33_spill] sm:$0xff] %v3655_v40  ;;  %3982 = vst [vmem:[#allocation34_spill] sm:$0xff] %v3657_v41 }
 0x145   :  { %v3659_v42 = vpop.f32.mrb[40].mxu0  ;;  %v3661_v43 = vpop.f32.mrb[40].mxu1 }
 0x146   :  { %3983 = vst [vmem:[#allocation35_spill] sm:$0xff] %v3659_v42  ;;  %3984 = vst [vmem:[#allocation36_spill] sm:$0xff] %v3661_v43  ;;  %v3663_v44 = vpop.f32.mrb[41].mxu0  ;;  %v3665_v45 = vpop.f32.mrb[41].mxu1 }
 0x147   :  { %3985 = vst [vmem:[#allocation37_spill] sm:$0xff] %v3663_v44  ;;  %3986 = vst [vmem:[#allocation38_spill] sm:$0xff] %v3665_v45  ;;  %v3667_v46 = vpop.f32.mrb[42].mxu0  ;;  %v3669_v47 = vpop.f32.mrb[42].mxu1 }
 0x148   :  { %3987 = vst [vmem:[#allocation39_spill] sm:$0xff] %v3667_v46  ;;  %3988 = vst [vmem:[#allocation40_spill] sm:$0xff] %v3669_v47  ;;  %v3671_v37 = vpop.f32.mrb[43].mxu0  ;;  %v3673_v38 = vpop.f32.mrb[43].mxu1 }
 0x149   :  { %3989 = vst [vmem:[#allocation41_spill] sm:$0xff] %v3671_v37  ;;  %3990 = vst [vmem:[#allocation42_spill] sm:$0xff] %v3673_v38 }
 0x14d   :  { %v3675_v39 = vpop.f32.mrb[44].mxu0  ;;  %v3677_v40 = vpop.f32.mrb[44].mxu1 }
 0x14e   :  { %3991 = vst [vmem:[#allocation43_spill] sm:$0xff] %v3675_v39  ;;  %3992 = vst [vmem:[#allocation44_spill] sm:$0xff] %v3677_v40  ;;  %v3679_v41 = vpop.f32.mrb[45].mxu0  ;;  %v3681_v42 = vpop.f32.mrb[45].mxu1 }
 0x14f   :  { %3993 = vst [vmem:[#allocation45_spill] sm:$0xff] %v3679_v41  ;;  %3994 = vst [vmem:[#allocation46_spill] sm:$0xff] %v3681_v42  ;;  %v3683_v43 = vpop.f32.mrb[46].mxu0  ;;  %v3685_v44 = vpop.f32.mrb[46].mxu1 }
 0x150   :  { %3995 = vst [vmem:[#allocation47_spill] sm:$0xff] %v3683_v43  ;;  %3996 = vst [vmem:[#allocation48_spill] sm:$0xff] %v3685_v44  ;;  %v3687_v45 = vpop.f32.mrb[47].mxu0  ;;  %v3689_v46 = vpop.f32.mrb[47].mxu1 }
 0x151   :  { %3997 = vst [vmem:[#allocation49_spill] sm:$0xff] %v3687_v45  ;;  %3998 = vst [vmem:[#allocation50_spill] sm:$0xff] %v3689_v46 }
 0x155   :  { %v3691_v47 = vpop.f32.mrb[48].mxu0  ;;  %v3693_v37 = vpop.f32.mrb[48].mxu1 }
 0x156   :  { %3999 = vst [vmem:[#allocation51_spill] sm:$0xff] %v3691_v47  ;;  %4000 = vst [vmem:[#allocation52_spill] sm:$0xff] %v3693_v37  ;;  %v3695_v38 = vpop.f32.mrb[49].mxu0  ;;  %v3697_v39 = vpop.f32.mrb[49].mxu1 }
 0x157   :  { %4001 = vst [vmem:[#allocation53_spill] sm:$0xff] %v3695_v38  ;;  %4002 = vst [vmem:[#allocation54_spill] sm:$0xff] %v3697_v39  ;;  %v3699_v40 = vpop.f32.mrb[50].mxu0  ;;  %v3701_v41 = vpop.f32.mrb[50].mxu1  ;;  %v3712_v39 = vld [vmem:[%s3948_s2] ss:$0 sm:$0xff] }
 0x158   :  { %4003 = vst [vmem:[#allocation55_spill] sm:$0xff] %v3699_v40  ;;  %4004 = vst [vmem:[#allocation56_spill] sm:$0xff] %v3701_v41  ;;  %v3703_v42 = vpop.f32.mrb[51].mxu0  ;;  %v3705_v43 = vpop.f32.mrb[51].mxu1 }
 0x159   :  { %4005 = vst [vmem:[#allocation57_spill] sm:$0xff] %v3703_v42  ;;  %4006 = vst [vmem:[#allocation58_spill] sm:$0xff] %v3705_v43 }
 0x15d   :  { %v2861_v44 = vpop.f32.mrb[52].mxu0  ;;  %v2965_v45 = vpop.f32.mrb[52].mxu1 }
 0x15e   :  { %v1778_v46 = vmax.f32 %v3499_v48, %v2861_v44  ;;  %v1830_v47 = vmax.f32 %v3501_v49, %v2965_v45  ;;  %v1153_v36 = vpop.f32.mrb[53].mxu0  ;;  %v1569_v37 = vpop.f32.mrb[53].mxu1 }
 0x15f   :  { %v1776_v40 = vmax.f32 %v3503_v50, %v1153_v36  ;;  %v1828_v41 = vmax.f32 %v3505_v51, %v1569_v37  ;;  %v2862_v42 = vpop.f32.mrb[54].mxu0  ;;  %v2966_v38 = vpop.f32.mrb[54].mxu1 }
 0x160   :  { %v1882_v43 = vmax.f32 %v1778_v46, %v1830_v47  ;;  %v1779_v35 = vmax.f32 %v3507_v52, %v2862_v42  ;;  %v1831_v48 = vmax.f32 %v3509_v53, %v2966_v38  ;;  %v1156_v44 = vpop.f32.mrb[55].mxu0  ;;  %v1572_v49 = vpop.f32.mrb[55].mxu1 }
 0x161   :  { %v1880_v45 = vmax.f32 %v1776_v40, %v1828_v41  ;;  %v1777_v34 = vmax.f32 %v3511_v54, %v1156_v44  ;;  %v1829_v33 = vmax.f32 %v3513_v55, %v1572_v49 }
 0x162   :  { %v1941_v32 = vadd.f32 %v3712_v39, %v1882_v43  ;;  %v1883_v31 = vmax.f32 %v1779_v35, %v1831_v48 }
 0x163   :  { %v1939_v50 = vadd.f32 %v3712_v39, %v1880_v45  ;;  %v1881_v51 = vmax.f32 %v1777_v34, %v1829_v33 }
 0x164   :  { %v1942_v36 = vadd.f32 %v3712_v39, %v1883_v31  ;;  %v1993_v53 = vmax.f32 %v1941_v32, 0.0 }
 0x165   :  { %v1940_v37 = vadd.f32 %v3712_v39, %v1881_v51  ;;  %v2865_v52 = vpop.f32.mrb[56].mxu0  ;;  %v2969_v42 = vpop.f32.mrb[56].mxu1  ;;  %v1991_v46 = vmax.f32 %v1939_v50, 0.0 }
 0x166   :  { %v1994_v38 = vmax.f32 %v1942_v36, 0.0  ;;  %v1782_v40 = vmax.f32 %v3515_v56, %v2865_v52  ;;  %v1834_v54 = vmax.f32 %v3517_v57, %v2969_v42  ;;  %v1169_v41 = vpop.f32.mrb[57].mxu0  ;;  %v1585_v55 = vpop.f32.mrb[57].mxu1 }
 0x167   :  { %v1992_v43 = vmax.f32 %v1940_v37, 0.0  ;;  %v1780_v35 = vmax.f32 %v3519_v58, %v1169_v41  ;;  %v1832_v33 = vmax.f32 %v3521_v59, %v1585_v55  ;;  %v2866_v34 = vpop.f32.mrb[58].mxu0  ;;  %v2970_v31 = vpop.f32.mrb[58].mxu1 }
 0x168   :  { %v2532_v47 = vpack.c.bf16 %v1994_v38, %v1993_v53  ;;  %v1886_v48 = vmax.f32 %v1782_v40, %v1834_v54  ;;  %v1783_v44 = vmax.f32 %v3523_v60, %v2866_v34  ;;  %v1835_v32 = vmax.f32 %v3525_v61, %v2970_v31  ;;  %v1172_v49 = vpop.f32.mrb[59].mxu0  ;;  %v1588_v56 = vpop.f32.mrb[59].mxu1 }
 0x169   :  { %v2527_v45 = vpack.c.bf16 %v1992_v43, %v1991_v46  ;;  %v1884_v57 = vmax.f32 %v1780_v35, %v1832_v33  ;;  %v1781_v51 = vmax.f32 %v3527_v62, %v1172_v49  ;;  %v1833_v50 = vmax.f32 %v3529_v63, %v1588_v56 }
 0x16a   :  { %2654 = vst [vmem:[%s3949_s3 + $0x8] sm:$0xff] %v2532_v47   ;;  %v1945_v58 = vadd.f32 %v3712_v39, %v1886_v48  ;;  %v1887_v59 = vmax.f32 %v1783_v44, %v1835_v32 }
 0x16b   :  { %2528 = vst [vmem:[%s3949_s3] sm:$0xff] %v2527_v45   ;;  %v1943_v60 = vadd.f32 %v3712_v39, %v1884_v57  ;;  %v1885_v61 = vmax.f32 %v1781_v51, %v1833_v50 }
 0x16c   :  { %v1946_v36 = vadd.f32 %v3712_v39, %v1887_v59  ;;  %v1997_v52 = vmax.f32 %v1945_v58, 0.0 }
 0x16d   :  { %v1944_v62 = vadd.f32 %v3712_v39, %v1885_v61  ;;  %v2869_v37 = vpop.f32.mrb[60].mxu0  ;;  %v2973_v63 = vpop.f32.mrb[60].mxu1  ;;  %v1995_v41 = vmax.f32 %v1943_v60, 0.0 }
 0x16e   :  { %v1998_v42 = vmax.f32 %v1946_v36, 0.0  ;;  %v1786_v53 = vmax.f32 %v3531_v0, %v2869_v37  ;;  %v1838_v38 = vmax.f32 %v3533_v1, %v2973_v63  ;;  %v1185_v40 = vpop.f32.mrb[61].mxu0  ;;  %v1601_v54 = vpop.f32.mrb[61].mxu1 }
 0x16f   :  { %v1996_v55 = vmax.f32 %v1944_v62, 0.0  ;;  %v1784_v46 = vmax.f32 %v3535_v2, %v1185_v40  ;;  %v1836_v43 = vmax.f32 %v3537_v3, %v1601_v54  ;;  %v2870_v35 = vpop.f32.mrb[62].mxu0  ;;  %v2974_v33 = vpop.f32.mrb[62].mxu1 }
 0x170   :  { %v2542_v34 = vpack.c.bf16 %v1998_v42, %v1997_v52  ;;  %v1890_v31 = vmax.f32 %v1786_v53, %v1838_v38  ;;  %v1787_v47 = vmax.f32 %v3539_v4, %v2870_v35  ;;  %v1839_v48 = vmax.f32 %v3541_v5, %v2974_v33  ;;  %v1188_v44 = vpop.f32.mrb[63].mxu0  ;;  %v1604_v0 = vpop.f32.mrb[63].mxu1 }
 0x171   :  { %v2537_v32 = vpack.c.bf16 %v1996_v55, %v1995_v41  ;;  %v1888_v1 = vmax.f32 %v1784_v46, %v1836_v43  ;;  %v1785_v49 = vmax.f32 %v3543_v6, %v1188_v44  ;;  %v1837_v56 = vmax.f32 %v3545_v7, %v1604_v0 }
 0x172   :  { %2656 = vst [vmem:[%s3949_s3 + $0x18] sm:$0xff] %v2542_v34   ;;  %v1949_v2 = vadd.f32 %v3712_v39, %v1890_v31  ;;  %v1891_v3 = vmax.f32 %v1787_v47, %v1839_v48 }
 0x173   :  { %2655 = vst [vmem:[%s3949_s3 + $0x10] sm:$0xff] %v2537_v32   ;;  %v1947_v4 = vadd.f32 %v3712_v39, %v1888_v1  ;;  %v1889_v5 = vmax.f32 %v1785_v49, %v1837_v56 }
 0x174   :  { %v1950_v45 = vadd.f32 %v3712_v39, %v1891_v3  ;;  %v2001_v51 = vmax.f32 %v1949_v2, 0.0 }
 0x175   :  { %v1948_v6 = vadd.f32 %v3712_v39, %v1889_v5  ;;  %v2873_v57 = vpop.f32.mrb[64].mxu0  ;;  %v2977_v7 = vpop.f32.mrb[64].mxu1  ;;  %v1999_v36 = vmax.f32 %v1947_v4, 0.0 }
 0x176   :  { %v2002_v50 = vmax.f32 %v1950_v45, 0.0  ;;  %v1790_v58 = vmax.f32 %v3547_v8, %v2873_v57  ;;  %v1842_v59 = vmax.f32 %v3549_v9, %v2977_v7  ;;  %v1201_v60 = vpop.f32.mrb[65].mxu0  ;;  %v1617_v61 = vpop.f32.mrb[65].mxu1 }
 0x177   :  { %v2000_v62 = vmax.f32 %v1948_v6, 0.0  ;;  %v1788_v37 = vmax.f32 %v3551_v10, %v1201_v60  ;;  %v1840_v63 = vmax.f32 %v3553_v11, %v1617_v61  ;;  %v2874_v52 = vpop.f32.mrb[66].mxu0  ;;  %v2978_v42 = vpop.f32.mrb[66].mxu1 }
 0x178   :  { %v2552_v53 = vpack.c.bf16 %v2002_v50, %v2001_v51  ;;  %v1894_v38 = vmax.f32 %v1790_v58, %v1842_v59  ;;  %v1791_v40 = vmax.f32 %v3555_v12, %v2874_v52  ;;  %v1843_v54 = vmax.f32 %v3557_v13, %v2978_v42  ;;  %v1204_v41 = vpop.f32.mrb[67].mxu0  ;;  %v1620_v8 = vpop.f32.mrb[67].mxu1 }
 0x179   :  { %v2547_v55 = vpack.c.bf16 %v2000_v62, %v1999_v36  ;;  %v1892_v9 = vmax.f32 %v1788_v37, %v1840_v63  ;;  %v1789_v46 = vmax.f32 %v3559_v14, %v1204_v41  ;;  %v1841_v43 = vmax.f32 %v3561_v15, %v1620_v8 }
 0x17a   :  { %2658 = vst [vmem:[%s3949_s3 + $0x28] sm:$0xff] %v2552_v53   ;;  %v1953_v10 = vadd.f32 %v3712_v39, %v1894_v38  ;;  %v1895_v11 = vmax.f32 %v1791_v40, %v1843_v54 }
 0x17b   :  { %2657 = vst [vmem:[%s3949_s3 + $0x20] sm:$0xff] %v2547_v55   ;;  %v1951_v12 = vadd.f32 %v3712_v39, %v1892_v9  ;;  %v1893_v13 = vmax.f32 %v1789_v46, %v1841_v43 }
 0x17c   :  { %v1954_v35 = vadd.f32 %v3712_v39, %v1895_v11  ;;  %v2005_v34 = vmax.f32 %v1953_v10, 0.0  ;;  %v4007_v11 = vld [vmem:[#allocation2_spill] sm:$0xff] }
 0x17d   :  { %v1952_v14 = vadd.f32 %v3712_v39, %v1893_v13  ;;  %v2877_v33 = vpop.f32.mrb[68].mxu0  ;;  %v2981_v15 = vpop.f32.mrb[68].mxu1  ;;  %v2003_v32 = vmax.f32 %v1951_v12, 0.0 }
 0x17e   :  { %v2006_v31 = vmax.f32 %v1954_v35, 0.0  ;;  %v1794_v47 = vmax.f32 %v3563_v16, %v2877_v33  ;;  %v1846_v48 = vmax.f32 %v3565_v17, %v2981_v15  ;;  %v1217_v44 = vpop.f32.mrb[69].mxu0  ;;  %v1633_v0 = vpop.f32.mrb[69].mxu1 }
 0x17f   :  { %v2004_v1 = vmax.f32 %v1952_v14, 0.0  ;;  %v1792_v49 = vmax.f32 %v3567_v18, %v1217_v44  ;;  %v1844_v56 = vmax.f32 %v3569_v19, %v1633_v0  ;;  %v2878_v2 = vpop.f32.mrb[70].mxu0  ;;  %v2982_v3 = vpop.f32.mrb[70].mxu1 }
 0x180   :  { %v2562_v4 = vpack.c.bf16 %v2006_v31, %v2005_v34  ;;  %v1898_v5 = vmax.f32 %v1794_v47, %v1846_v48  ;;  %v1795_v45 = vmax.f32 %v3571_v20, %v2878_v2  ;;  %v1847_v6 = vmax.f32 %v3573_v21, %v2982_v3  ;;  %v1220_v57 = vpop.f32.mrb[71].mxu0  ;;  %v1636_v16 = vpop.f32.mrb[71].mxu1  ;;  %v4008_v34 = vld [vmem:[#allocation3_spill] sm:$0xff]  ;;  %v4009_v47 = vld [vmem:[#allocation4_spill] sm:$0xff]  ;;  %v4011_v2 = vld [vmem:[#allocation6_spill] sm:$0xff] }
 0x181   :  { %v2557_v7 = vpack.c.bf16 %v2004_v1, %v2003_v32  ;;  %v1896_v17 = vmax.f32 %v1792_v49, %v1844_v56  ;;  %v1793_v51 = vmax.f32 %v3575_v22, %v1220_v57  ;;  %v1845_v50 = vmax.f32 %v3577_v23, %v1636_v16  ;;  %v4010_v49 = vld [vmem:[#allocation5_spill] sm:$0xff]  ;;  %v4012_v57 = vld [vmem:[#allocation7_spill] sm:$0xff] }
 0x182   :  { %2660 = vst [vmem:[%s3949_s3 + $0x38] sm:$0xff] %v2562_v4   ;;  %v1957_v18 = vadd.f32 %v3712_v39, %v1898_v5  ;;  %v1899_v19 = vmax.f32 %v1795_v45, %v1847_v6 }
 0x183   :  { %2659 = vst [vmem:[%s3949_s3 + $0x30] sm:$0xff] %v2557_v7   ;;  %v1955_v20 = vadd.f32 %v3712_v39, %v1896_v17  ;;  %v1897_v21 = vmax.f32 %v1793_v51, %v1845_v50  ;;  %v4013_v7 = vld [vmem:[#allocation8_spill] sm:$0xff] }
 0x184   :  { %v1958_v58 = vadd.f32 %v3712_v39, %v1899_v19  ;;  %v2009_v60 = vmax.f32 %v1957_v18, 0.0 }
 0x185   :  { %v1956_v22 = vadd.f32 %v3712_v39, %v1897_v21  ;;  %v2881_v59 = vpop.f32.mrb[72].mxu0  ;;  %v2985_v23 = vpop.f32.mrb[72].mxu1  ;;  %v2007_v52 = vmax.f32 %v1955_v20, 0.0  ;;  %v4014_v20 = vld [vmem:[#allocation9_spill] sm:$0xff] }
 0x186   :  { %v2010_v61 = vmax.f32 %v1958_v58, 0.0  ;;  %v1798_v36 = vmax.f32 %v3579_v24, %v2881_v59  ;;  %v1850_v62 = vmax.f32 %v3581_v25, %v2985_v23  ;;  %v1233_v37 = vpop.f32.mrb[73].mxu0  ;;  %v1649_v63 = vpop.f32.mrb[73].mxu1  ;;  %v4015_v58 = vld [vmem:[#allocation10_spill] sm:$0xff] }
 0x187   :  { %v2008_v42 = vmax.f32 %v1956_v22, 0.0  ;;  %v1796_v53 = vmax.f32 %v3583_v26, %v1233_v37  ;;  %v1848_v38 = vmax.f32 %v3585_v27, %v1649_v63  ;;  %v2882_v40 = vpop.f32.mrb[74].mxu0  ;;  %v2986_v54 = vpop.f32.mrb[74].mxu1 }
 0x188   :  { %v2572_v41 = vpack.c.bf16 %v2010_v61, %v2009_v60  ;;  %v1902_v8 = vmax.f32 %v1798_v36, %v1850_v62  ;;  %v1799_v55 = vmax.f32 %v3587_v28, %v2882_v40  ;;  %v1851_v9 = vmax.f32 %v3589_v29, %v2986_v54  ;;  %v1236_v46 = vpop.f32.mrb[75].mxu0  ;;  %v1652_v24 = vpop.f32.mrb[75].mxu1  ;;  %v4017_v40 = vld [vmem:[#allocation12_spill] sm:$0xff] }
 0x189   :  { %v2567_v43 = vpack.c.bf16 %v2008_v42, %v2007_v52  ;;  %v1900_v25 = vmax.f32 %v1796_v53, %v1848_v38  ;;  %v1797_v10 = vmax.f32 %v3591_v30, %v1236_v46  ;;  %v1849_v12 = vmax.f32 %v4007_v11, %v1652_v24  ;;  %v4016_v53 = vld [vmem:[#allocation11_spill] sm:$0xff]  ;;  %v4018_v46 = vld [vmem:[#allocation13_spill] sm:$0xff] }
 0x18a   :  { %2662 = vst [vmem:[%s3949_s3 + $0x48] sm:$0xff] %v2572_v41   ;;  %v1961_v26 = vadd.f32 %v3712_v39, %v1902_v8  ;;  %v1903_v27 = vmax.f32 %v1799_v55, %v1851_v9 }
 0x18b   :  { %2661 = vst [vmem:[%s3949_s3 + $0x40] sm:$0xff] %v2567_v43   ;;  %v1959_v28 = vadd.f32 %v3712_v39, %v1900_v25  ;;  %v1901_v29 = vmax.f32 %v1797_v10, %v1849_v12  ;;  %v4019_v43 = vld [vmem:[#allocation14_spill] sm:$0xff] }
 0x18c   :  { %v1962_v13 = vadd.f32 %v3712_v39, %v1903_v27  ;;  %v2013_v33 = vmax.f32 %v1961_v26, 0.0  ;;  %v4020_v27 = vld [vmem:[#allocation15_spill] sm:$0xff] }
 0x18d   :  { %v1960_v30 = vadd.f32 %v3712_v39, %v1901_v29  ;;  %v2885_v35 = vpop.f32.mrb[76].mxu0  ;;  %v2989_v14 = vpop.f32.mrb[76].mxu1  ;;  %v2011_v32 = vmax.f32 %v1959_v28, 0.0  ;;  %v4021_v29 = vld [vmem:[#allocation16_spill] sm:$0xff] }
 0x18e   :  { %v2014_v15 = vmax.f32 %v1962_v13, 0.0  ;;  %v1802_v31 = vmax.f32 %v4008_v34, %v2885_v35  ;;  %v1854_v48 = vmax.f32 %v4009_v47, %v2989_v14  ;;  %v1249_v44 = vpop.f32.mrb[77].mxu0  ;;  %v1665_v0 = vpop.f32.mrb[77].mxu1 }
 0x18f   :  { %v2012_v1 = vmax.f32 %v1960_v30, 0.0  ;;  %v1800_v56 = vmax.f32 %v4010_v49, %v1249_v44  ;;  %v1852_v3 = vmax.f32 %v4011_v2, %v1665_v0  ;;  %v2886_v4 = vpop.f32.mrb[78].mxu0  ;;  %v2990_v5 = vpop.f32.mrb[78].mxu1 }
 0x190   :  { %v2582_v45 = vpack.c.bf16 %v2014_v15, %v2013_v33  ;;  %v1906_v6 = vmax.f32 %v1802_v31, %v1854_v48  ;;  %v1803_v16 = vmax.f32 %v4012_v57, %v2886_v4  ;;  %v1855_v17 = vmax.f32 %v4013_v7, %v2990_v5  ;;  %v1252_v51 = vpop.f32.mrb[79].mxu0  ;;  %v1668_v50 = vpop.f32.mrb[79].mxu1  ;;  %v4022_v15 = vld [vmem:[#allocation17_spill] sm:$0xff]  ;;  %v4023_v31 = vld [vmem:[#allocation18_spill] sm:$0xff]  ;;  %v4024_v5 = vld [vmem:[#allocation19_spill] sm:$0xff] }
 0x191   :  { %v2577_v18 = vpack.c.bf16 %v2012_v1, %v2011_v32  ;;  %v1904_v19 = vmax.f32 %v1800_v56, %v1852_v3  ;;  %v1801_v21 = vmax.f32 %v4014_v20, %v1252_v51  ;;  %v1853_v22 = vmax.f32 %v4015_v58, %v1668_v50  ;;  %v4026_v50 = vld [vmem:[#allocation21_spill] sm:$0xff] }
 0x192   :  { %2664 = vst [vmem:[%s3949_s3 + $0x58] sm:$0xff] %v2582_v45   ;;  %v1965_v59 = vadd.f32 %v3712_v39, %v1906_v6  ;;  %v1907_v23 = vmax.f32 %v1803_v16, %v1855_v17  ;;  %v4025_v6 = vld [vmem:[#allocation20_spill] sm:$0xff] }
 0x193   :  { %2663 = vst [vmem:[%s3949_s3 + $0x50] sm:$0xff] %v2577_v18   ;;  %v1963_v60 = vadd.f32 %v3712_v39, %v1904_v19  ;;  %v1905_v61 = vmax.f32 %v1801_v21, %v1853_v22  ;;  %v4027_v19 = vld [vmem:[#allocation22_spill] sm:$0xff] }
 0x194   :  { %v1966_v36 = vadd.f32 %v3712_v39, %v1907_v23  ;;  %v2017_v52 = vmax.f32 %v1965_v59, 0.0  ;;  %v4028_v23 = vld [vmem:[#allocation23_spill] sm:$0xff] }
 0x195   :  { %v1964_v62 = vadd.f32 %v3712_v39, %v1905_v61  ;;  %v2889_v37 = vpop.f32.mrb[80].mxu0  ;;  %v2993_v63 = vpop.f32.mrb[80].mxu1  ;;  %v2015_v55 = vmax.f32 %v1963_v60, 0.0  ;;  %v4029_v61 = vld [vmem:[#allocation24_spill] sm:$0xff] }
 0x196   :  { %v2018_v42 = vmax.f32 %v1966_v36, 0.0  ;;  %v1806_v38 = vmax.f32 %v4016_v53, %v2889_v37  ;;  %v1858_v54 = vmax.f32 %v4017_v40, %v2993_v63  ;;  %v1265_v41 = vpop.f32.mrb[81].mxu0  ;;  %v1681_v8 = vpop.f32.mrb[81].mxu1 }
 0x197   :  { %v2016_v9 = vmax.f32 %v1964_v62, 0.0  ;;  %v1804_v24 = vmax.f32 %v4018_v46, %v1265_v41  ;;  %v1856_v25 = vmax.f32 %v4019_v43, %v1681_v8  ;;  %v2890_v10 = vpop.f32.mrb[82].mxu0  ;;  %v2994_v11 = vpop.f32.mrb[82].mxu1 }
 0x198   :  { %v2592_v12 = vpack.c.bf16 %v2018_v42, %v2017_v52  ;;  %v1910_v26 = vmax.f32 %v1806_v38, %v1858_v54  ;;  %v1807_v28 = vmax.f32 %v4020_v27, %v2890_v10  ;;  %v1859_v13 = vmax.f32 %v4021_v29, %v2994_v11  ;;  %v1268_v30 = vpop.f32.mrb[83].mxu0  ;;  %v1684_v35 = vpop.f32.mrb[83].mxu1  ;;  %v4030_v42 = vld [vmem:[#allocation25_spill] sm:$0xff]  ;;  %v4031_v38 = vld [vmem:[#allocation26_spill] sm:$0xff]  ;;  %v4032_v11 = vld [vmem:[#allocation27_spill] sm:$0xff] }
 0x199   :  { %v2587_v14 = vpack.c.bf16 %v2016_v9, %v2015_v55  ;;  %v1908_v33 = vmax.f32 %v1804_v24, %v1856_v25  ;;  %v1805_v34 = vmax.f32 %v4022_v15, %v1268_v30  ;;  %v1857_v47 = vmax.f32 %v4023_v31, %v1684_v35  ;;  %v4034_v35 = vld [vmem:[#allocation29_spill] sm:$0xff] }
 0x19a   :  { %2666 = vst [vmem:[%s3949_s3 + $0x68] sm:$0xff] %v2592_v12   ;;  %v1969_v48 = vadd.f32 %v3712_v39, %v1910_v26  ;;  %v1911_v44 = vmax.f32 %v1807_v28, %v1859_v13  ;;  %v4033_v26 = vld [vmem:[#allocation28_spill] sm:$0xff] }
 0x19b   :  { %2665 = vst [vmem:[%s3949_s3 + $0x60] sm:$0xff] %v2587_v14   ;;  %v1967_v0 = vadd.f32 %v3712_v39, %v1908_v33  ;;  %v1909_v32 = vmax.f32 %v1805_v34, %v1857_v47  ;;  %v4035_v33 = vld [vmem:[#allocation30_spill] sm:$0xff] }
 0x19c   :  { %v1970_v1 = vadd.f32 %v3712_v39, %v1911_v44  ;;  %v2021_v3 = vmax.f32 %v1969_v48, 0.0  ;;  %v4036_v44 = vld [vmem:[#allocation31_spill] sm:$0xff] }
 0x19d   :  { %v1968_v49 = vadd.f32 %v3712_v39, %v1909_v32  ;;  %v2893_v56 = vpop.f32.mrb[84].mxu0  ;;  %v2997_v2 = vpop.f32.mrb[84].mxu1  ;;  %v2019_v17 = vmax.f32 %v1967_v0, 0.0  ;;  %v4037_v32 = vld [vmem:[#allocation32_spill] sm:$0xff] }
 0x19e   :  { %v2022_v4 = vmax.f32 %v1970_v1, 0.0  ;;  %v1810_v45 = vmax.f32 %v4024_v5, %v2893_v56  ;;  %v1862_v57 = vmax.f32 %v4025_v6, %v2997_v2  ;;  %v1281_v16 = vpop.f32.mrb[85].mxu0  ;;  %v1697_v7 = vpop.f32.mrb[85].mxu1 }
 0x19f   :  { %v2020_v51 = vmax.f32 %v1968_v49, 0.0  ;;  %v1808_v18 = vmax.f32 %v4026_v50, %v1281_v16  ;;  %v1860_v20 = vmax.f32 %v4027_v19, %v1697_v7  ;;  %v2894_v21 = vpop.f32.mrb[86].mxu0  ;;  %v2998_v58 = vpop.f32.mrb[86].mxu1 }
 0x1a0   :  { %v2602_v22 = vpack.c.bf16 %v2022_v4, %v2021_v3  ;;  %v1914_v59 = vmax.f32 %v1810_v45, %v1862_v57  ;;  %v1811_v60 = vmax.f32 %v4028_v23, %v2894_v21  ;;  %v1863_v36 = vmax.f32 %v4029_v61, %v2998_v58  ;;  %v1284_v62 = vpop.f32.mrb[87].mxu0  ;;  %v1700_v37 = vpop.f32.mrb[87].mxu1  ;;  %v4038_v4 = vld [vmem:[#allocation33_spill] sm:$0xff]  ;;  %v4039_v45 = vld [vmem:[#allocation34_spill] sm:$0xff]  ;;  %v4040_v58 = vld [vmem:[#allocation35_spill] sm:$0xff] }
 0x1a1   :  { %v2597_v63 = vpack.c.bf16 %v2020_v51, %v2019_v17  ;;  %v1912_v52 = vmax.f32 %v1808_v18, %v1860_v20  ;;  %v1809_v53 = vmax.f32 %v4030_v42, %v1284_v62  ;;  %v1861_v40 = vmax.f32 %v4031_v38, %v1700_v37  ;;  %v4042_v37 = vld [vmem:[#allocation37_spill] sm:$0xff] }
 0x1a2   :  { %2668 = vst [vmem:[%s3949_s3 + $0x78] sm:$0xff] %v2602_v22   ;;  %v1973_v54 = vadd.f32 %v3712_v39, %v1914_v59  ;;  %v1915_v41 = vmax.f32 %v1811_v60, %v1863_v36  ;;  %v4041_v59 = vld [vmem:[#allocation36_spill] sm:$0xff] }
 0x1a3   :  { %2667 = vst [vmem:[%s3949_s3 + $0x70] sm:$0xff] %v2597_v63   ;;  %v1971_v8 = vadd.f32 %v3712_v39, %v1912_v52  ;;  %v1913_v55 = vmax.f32 %v1809_v53, %v1861_v40  ;;  %v4043_v52 = vld [vmem:[#allocation38_spill] sm:$0xff] }
 0x1a4   :  { %v1974_v9 = vadd.f32 %v3712_v39, %v1915_v41  ;;  %v2025_v25 = vmax.f32 %v1973_v54, 0.0  ;;  %v4044_v41 = vld [vmem:[#allocation39_spill] sm:$0xff] }
 0x1a5   :  { %v1972_v46 = vadd.f32 %v3712_v39, %v1913_v55  ;;  %v2897_v24 = vpop.f32.mrb[88].mxu0  ;;  %v3001_v43 = vpop.f32.mrb[88].mxu1  ;;  %v2023_v13 = vmax.f32 %v1971_v8, 0.0  ;;  %v4045_v55 = vld [vmem:[#allocation40_spill] sm:$0xff] }
 0x1a6   :  { %v2026_v10 = vmax.f32 %v1974_v9, 0.0  ;;  %v1814_v12 = vmax.f32 %v4032_v11, %v2897_v24  ;;  %v1866_v27 = vmax.f32 %v4033_v26, %v3001_v43  ;;  %v1297_v28 = vpop.f32.mrb[89].mxu0  ;;  %v1713_v29 = vpop.f32.mrb[89].mxu1 }
 0x1a7   :  { %v2024_v30 = vmax.f32 %v1972_v46, 0.0  ;;  %v1812_v14 = vmax.f32 %v4034_v35, %v1297_v28  ;;  %v1864_v15 = vmax.f32 %v4035_v33, %v1713_v29  ;;  %v2898_v34 = vpop.f32.mrb[90].mxu0  ;;  %v3002_v31 = vpop.f32.mrb[90].mxu1 }
 0x1a8   :  { %v2612_v47 = vpack.c.bf16 %v2026_v10, %v2025_v25  ;;  %v1918_v48 = vmax.f32 %v1814_v12, %v1866_v27  ;;  %v1815_v0 = vmax.f32 %v4036_v44, %v2898_v34  ;;  %v1867_v1 = vmax.f32 %v4037_v32, %v3002_v31  ;;  %v1300_v49 = vpop.f32.mrb[91].mxu0  ;;  %v1716_v56 = vpop.f32.mrb[91].mxu1  ;;  %v4046_v10 = vld [vmem:[#allocation41_spill] sm:$0xff]  ;;  %v4047_v12 = vld [vmem:[#allocation42_spill] sm:$0xff]  ;;  %v4048_v31 = vld [vmem:[#allocation43_spill] sm:$0xff] }
 0x1a9   :  { %v2607_v2 = vpack.c.bf16 %v2024_v30, %v2023_v13  ;;  %v1916_v3 = vmax.f32 %v1812_v14, %v1864_v15  ;;  %v1813_v5 = vmax.f32 %v4038_v4, %v1300_v49  ;;  %v1865_v6 = vmax.f32 %v4039_v45, %v1716_v56  ;;  %v4050_v56 = vld [vmem:[#allocation45_spill] sm:$0xff] }
 0x1aa   :  { %2670 = vst [vmem:[%s3949_s3 + $0x88] sm:$0xff] %v2612_v47   ;;  %v1977_v57 = vadd.f32 %v3712_v39, %v1918_v48  ;;  %v1919_v16 = vmax.f32 %v1815_v0, %v1867_v1  ;;  %v4049_v48 = vld [vmem:[#allocation44_spill] sm:$0xff] }
 0x1ab   :  { %2669 = vst [vmem:[%s3949_s3 + $0x80] sm:$0xff] %v2607_v2   ;;  %v1975_v7 = vadd.f32 %v3712_v39, %v1916_v3  ;;  %v1917_v17 = vmax.f32 %v1813_v5, %v1865_v6  ;;  %v4051_v3 = vld [vmem:[#allocation46_spill] sm:$0xff] }
 0x1ac   :  { %v1978_v51 = vadd.f32 %v3712_v39, %v1919_v16  ;;  %v2029_v20 = vmax.f32 %v1977_v57, 0.0  ;;  %v4052_v16 = vld [vmem:[#allocation47_spill] sm:$0xff] }
 0x1ad   :  { %v1976_v50 = vadd.f32 %v3712_v39, %v1917_v17  ;;  %v2901_v18 = vpop.f32.mrb[92].mxu0  ;;  %v3005_v19 = vpop.f32.mrb[92].mxu1  ;;  %v2027_v36 = vmax.f32 %v1975_v7, 0.0  ;;  %v4053_v17 = vld [vmem:[#allocation48_spill] sm:$0xff] }
 0x1ae   :  { %v2030_v21 = vmax.f32 %v1978_v51, 0.0  ;;  %v1818_v22 = vmax.f32 %v4040_v58, %v2901_v18  ;;  %v1870_v23 = vmax.f32 %v4041_v59, %v3005_v19  ;;  %v1313_v60 = vpop.f32.mrb[93].mxu0  ;;  %v1729_v61 = vpop.f32.mrb[93].mxu1 }
 0x1af   :  { %v2028_v62 = vmax.f32 %v1976_v50, 0.0  ;;  %v1816_v63 = vmax.f32 %v4042_v37, %v1313_v60  ;;  %v1868_v42 = vmax.f32 %v4043_v52, %v1729_v61  ;;  %v2902_v53 = vpop.f32.mrb[94].mxu0  ;;  %v3006_v38 = vpop.f32.mrb[94].mxu1 }
 0x1b0   :  { %v2622_v40 = vpack.c.bf16 %v2030_v21, %v2029_v20  ;;  %v1922_v54 = vmax.f32 %v1818_v22, %v1870_v23  ;;  %v1819_v8 = vmax.f32 %v4044_v41, %v2902_v53  ;;  %v1871_v9 = vmax.f32 %v4045_v55, %v3006_v38  ;;  %v1316_v46 = vpop.f32.mrb[95].mxu0  ;;  %v1732_v24 = vpop.f32.mrb[95].mxu1  ;;  %v4054_v21 = vld [vmem:[#allocation49_spill] sm:$0xff]  ;;  %v4055_v22 = vld [vmem:[#allocation50_spill] sm:$0xff]  ;;  %v4056_v38 = vld [vmem:[#allocation51_spill] sm:$0xff] }
 0x1b1   :  { %v2617_v43 = vpack.c.bf16 %v2028_v62, %v2027_v36  ;;  %v1920_v25 = vmax.f32 %v1816_v63, %v1868_v42  ;;  %v1817_v11 = vmax.f32 %v4046_v10, %v1316_v46  ;;  %v1869_v26 = vmax.f32 %v4047_v12, %v1732_v24  ;;  %v4058_v24 = vld [vmem:[#allocation53_spill] sm:$0xff] }
 0x1b2   :  { %2672 = vst [vmem:[%s3949_s3 + $0x98] sm:$0xff] %v2622_v40   ;;  %v1981_v27 = vadd.f32 %v3712_v39, %v1922_v54  ;;  %v1923_v28 = vmax.f32 %v1819_v8, %v1871_v9  ;;  %v4057_v54 = vld [vmem:[#allocation52_spill] sm:$0xff] }
 0x1b3   :  { %2671 = vst [vmem:[%s3949_s3 + $0x90] sm:$0xff] %v2617_v43   ;;  %v1979_v29 = vadd.f32 %v3712_v39, %v1920_v25  ;;  %v1921_v13 = vmax.f32 %v1817_v11, %v1869_v26  ;;  %v4059_v25 = vld [vmem:[#allocation54_spill] sm:$0xff] }
 0x1b4   :  { %v1982_v30 = vadd.f32 %v3712_v39, %v1923_v28  ;;  %v2033_v15 = vmax.f32 %v1981_v27, 0.0  ;;  %v4060_v28 = vld [vmem:[#allocation55_spill] sm:$0xff] }
 0x1b5   :  { %v1980_v35 = vadd.f32 %v3712_v39, %v1921_v13  ;;  %v2905_v14 = vpop.f32.mrb[96].mxu0  ;;  %v3009_v33 = vpop.f32.mrb[96].mxu1  ;;  %v2031_v1 = vmax.f32 %v1979_v29, 0.0  ;;  %v4061_v13 = vld [vmem:[#allocation56_spill] sm:$0xff] }
 0x1b6   :  { %v2034_v34 = vmax.f32 %v1982_v30, 0.0  ;;  %v1822_v47 = vmax.f32 %v4048_v31, %v2905_v14  ;;  %v1874_v44 = vmax.f32 %v4049_v48, %v3009_v33  ;;  %v1329_v0 = vpop.f32.mrb[97].mxu0  ;;  %v1745_v32 = vpop.f32.mrb[97].mxu1 }
 0x1b7   :  { %v2032_v49 = vmax.f32 %v1980_v35, 0.0  ;;  %v1820_v2 = vmax.f32 %v4050_v56, %v1329_v0  ;;  %v1872_v4 = vmax.f32 %v4051_v3, %v1745_v32  ;;  %v2906_v5 = vpop.f32.mrb[98].mxu0  ;;  %v3010_v45 = vpop.f32.mrb[98].mxu1 }
 0x1b8   :  { %v2632_v6 = vpack.c.bf16 %v2034_v34, %v2033_v15  ;;  %v1926_v57 = vmax.f32 %v1822_v47, %v1874_v44  ;;  %v1823_v7 = vmax.f32 %v4052_v16, %v2906_v5  ;;  %v1875_v51 = vmax.f32 %v4053_v17, %v3010_v45  ;;  %v1332_v50 = vpop.f32.mrb[99].mxu0  ;;  %v1748_v18 = vpop.f32.mrb[99].mxu1  ;;  %v4062_v34 = vld [vmem:[#allocation57_spill] sm:$0xff]  ;;  %v4063_v47 = vld [vmem:[#allocation58_spill] sm:$0xff] }
 0x1b9   :  { %v2627_v19 = vpack.c.bf16 %v2032_v49, %v2031_v1  ;;  %v1924_v20 = vmax.f32 %v1820_v2, %v1872_v4  ;;  %v1821_v58 = vmax.f32 %v4054_v21, %v1332_v50  ;;  %v1873_v59 = vmax.f32 %v4055_v22, %v1748_v18 }
 0x1ba   :  { %2674 = vst [vmem:[%s3949_s3 + $0xa8] sm:$0xff] %v2632_v6   ;;  %v1985_v23 = vadd.f32 %v3712_v39, %v1926_v57  ;;  %v1927_v60 = vmax.f32 %v1823_v7, %v1875_v51 }
 0x1bb   :  { %2673 = vst [vmem:[%s3949_s3 + $0xa0] sm:$0xff] %v2627_v19   ;;  %v1983_v61 = vadd.f32 %v3712_v39, %v1924_v20  ;;  %v1925_v36 = vmax.f32 %v1821_v58, %v1873_v59 }
 0x1bc   :  { %v1986_v62 = vadd.f32 %v3712_v39, %v1927_v60  ;;  %v2037_v42 = vmax.f32 %v1985_v23, 0.0 }
 0x1bd   :  { %v1984_v37 = vadd.f32 %v3712_v39, %v1925_v36  ;;  %v2909_v63 = vpop.f32.mrb[100].mxu0  ;;  %v3013_v52 = vpop.f32.mrb[100].mxu1  ;;  %v2035_v9 = vmax.f32 %v1983_v61, 0.0 }
 0x1be   :  { %v2038_v53 = vmax.f32 %v1986_v62, 0.0  ;;  %v1826_v40 = vmax.f32 %v4056_v38, %v2909_v63  ;;  %v1878_v41 = vmax.f32 %v4057_v54, %v3013_v52  ;;  %v1345_v8 = vpop.f32.mrb[101].mxu0  ;;  %v1761_v55 = vpop.f32.mrb[101].mxu1 }
 0x1bf   :  { %v2036_v46 = vmax.f32 %v1984_v37, 0.0  ;;  %v1824_v43 = vmax.f32 %v4058_v24, %v1345_v8  ;;  %v1876_v10 = vmax.f32 %v4059_v25, %v1761_v55  ;;  %v2910_v11 = vpop.f32.mrb[102].mxu0  ;;  %v3014_v12 = vpop.f32.mrb[102].mxu1 }
 0x1c0   :  { %v2642_v26 = vpack.c.bf16 %v2038_v53, %v2037_v42  ;;  %v1930_v27 = vmax.f32 %v1826_v40, %v1878_v41  ;;  %v1827_v29 = vmax.f32 %v4060_v28, %v2910_v11  ;;  %v1879_v30 = vmax.f32 %v4061_v13, %v3014_v12  ;;  %v1348_v35 = vpop.f32.mrb[103].mxu0  ;;  %v1764_v14 = vpop.f32.mrb[103].mxu1 }
 0x1c1   :  { %v2637_v33 = vpack.c.bf16 %v2036_v46, %v2035_v9  ;;  %v1928_v15 = vmax.f32 %v1824_v43, %v1876_v10  ;;  %v1825_v31 = vmax.f32 %v4062_v34, %v1348_v35  ;;  %v1877_v48 = vmax.f32 %v4063_v47, %v1764_v14 }
 0x1c2   :  { %2676 = vst [vmem:[%s3949_s3 + $0xb8] sm:$0xff] %v2642_v26   ;;  %v1989_v44 = vadd.f32 %v3712_v39, %v1930_v27  ;;  %v1931_v0 = vmax.f32 %v1827_v29, %v1879_v30 }
 0x1c3   :  { %2675 = vst [vmem:[%s3949_s3 + $0xb0] sm:$0xff] %v2637_v33   ;;  %v1987_v32 = vadd.f32 %v3712_v39, %v1928_v15  ;;  %v1929_v1 = vmax.f32 %v1825_v31, %v1877_v48 }
 0x1c4   :  { %v1990_v49 = vadd.f32 %v3712_v39, %v1931_v0  ;;  %v2041_v2 = vmax.f32 %v1989_v44, 0.0 }
 0x1c5   :  { %v1988_v56 = vadd.f32 %v3712_v39, %v1929_v1  ;;  %v2039_v4 = vmax.f32 %v1987_v32, 0.0 }
 0x1c6   :  { %v2042_v3 = vmax.f32 %v1990_v49, 0.0 }
 0x1c7   :  { %v2040_v5 = vmax.f32 %v1988_v56, 0.0 }
 0x1c8   :  { %v2652_v45 = vpack.c.bf16 %v2042_v3, %v2041_v2 }
 0x1c9   :  { %v2647_v6 = vpack.c.bf16 %v2040_v5, %v2039_v4 }
 0x1ca   :  { %2678 = vst [vmem:[%s3949_s3 + $0xc8] sm:$0xff] %v2652_v45  }
 0x1cb   :  { %2677 = vst [vmem:[%s3949_s3 + $0xc0] sm:$0xff] %v2647_v6  }

// kernel: cnn_forward.4
= control target key start
LH: loop header
LB: loop body
LE: loop exit
PB: predicated region body
PF: predicated region fallthrough
CT: control target
= control target key end

     0   :  { %v902_v0 = vmov 0   ;;  %s1198_s1 = inlined_call_operand.vmem [shape: bf16[256,128], index: 1, kind: input, shape index: {}]   ;;  %s1199_s0 = inlined_call_operand.vmem [shape: bf16[320,256], index: 0, kind: input, shape index: {}]   ;;  %s1200_s2 = inlined_call_operand.vmem [shape: f32[1,128], index: 2, kind: input, shape index: {}]   ;;  %s1201_s3 = inlined_call_operand.vmem [shape: bf16[80,128], index: 3, kind: output, shape index: {}]  }
   0x1   :  { %383 = vmatprep.subr.bf16.mxu0 %v902_v0  ;;  %793 = vmatprep.subr.bf16.mxu1 %v902_v0  ;;  %v826_v1 = vld [vmem:[%s1198_s1] sm:$0xff]   ;;  %v827_v2 = vld [vmem:[%s1198_s1 + $0x8] sm:$0xff]   ;;  %v828_v3 = vld [vmem:[%s1198_s1 + $0x10] sm:$0xff]  }
   0x2   :  { %384 = vmatpush1.bf16.msra.mxu0 %v826_v1  ;;  %809 = vmatpush1.bf16.msra.mxu1 %v826_v1  ;;  %v829_v4 = vld [vmem:[%s1198_s1 + $0x18] sm:$0xff]   ;;  %v830_v5 = vld [vmem:[%s1198_s1 + $0x20] sm:$0xff]   ;;  %v831_v7 = vld [vmem:[%s1198_s1 + $0x28] sm:$0xff]  }
   0x3   :  { %385 = vmatprep.subr.bf16.mxu0 %v902_v0  ;;  %794 = vmatprep.subr.bf16.mxu1 %v902_v0  ;;  %v844_v6 = vld [vmem:[%s1199_s0 + $0x4] ss:$8 sps:$4 sm:$0xff]   ;;  %v832_v9 = vld [vmem:[%s1198_s1 + $0x30] sm:$0xff]   ;;  %v833_v10 = vld [vmem:[%s1198_s1 + $0x38] sm:$0xff]  }
   0x4   :  { %v847_v8 = vld [vmem:[%s1199_s0 + $0xa4] ss:$8 sps:$4 sm:$0xff]   ;;  %415 = vmatprep.mubr.bf16.mxu0 %v844_v6  ;;  %v836_v13 = vld [vmem:[%s1198_s1 + $0x50] sm:$0xff]   ;;  %v837_v14 = vld [vmem:[%s1198_s1 + $0x58] sm:$0xff]  }
   0x5   :  { %495 = vmatprep.mubr.bf16.mxu1 %v847_v8  ;;  %v834_v11 = vld [vmem:[%s1198_s1 + $0x40] sm:$0xff]   ;;  %v835_v12 = vld [vmem:[%s1198_s1 + $0x48] sm:$0xff]   ;;  %v840_v17 = vld [vmem:[%s1198_s1 + $0x70] sm:$0xff]  }
   0x6   :  { %386 = vmatpush1.bf16.msra.mxu0 %v827_v2  ;;  %810 = vmatpush1.bf16.msra.mxu1 %v827_v2  ;;  %v838_v15 = vld [vmem:[%s1198_s1 + $0x60] sm:$0xff]   ;;  %v839_v16 = vld [vmem:[%s1198_s1 + $0x68] sm:$0xff]   ;;  %v841_v18 = vld [vmem:[%s1198_s1 + $0x78] sm:$0xff]  }
   0x7   :  { %387 = vmatprep.subr.bf16.mxu0 %v902_v0  ;;  %795 = vmatprep.subr.bf16.mxu1 %v902_v0  ;;  %v842_v19 = vld [vmem:[%s1199_s0] ss:$8 sps:$4 sm:$0xff]   ;;  %v848_v21 = vld [vmem:[%s1199_s0 + $0x14] ss:$8 sps:$4 sm:$0xff]   ;;  %v852_v23 = vld [vmem:[%s1199_s0 + $0x10] ss:$8 sps:$4 sm:$0xff]  }
   0x8   :  { %v845_v20 = vld [vmem:[%s1199_s0 + $0xa0] ss:$8 sps:$4 sm:$0xff]   ;;  %v850_v22 = vld [vmem:[%s1199_s0 + $0xb4] ss:$8 sps:$4 sm:$0xff]   ;;  %v853_v24 = vld [vmem:[%s1199_s0 + $0xb0] ss:$8 sps:$4 sm:$0xff]  }
   0x9   :  { %v854_v25 = vld [vmem:[%s1199_s0 + $0x24] ss:$8 sps:$4 sm:$0xff]   ;;  %v858_v27 = vld [vmem:[%s1199_s0 + $0x20] ss:$8 sps:$4 sm:$0xff]   ;;  %v860_v29 = vld [vmem:[%s1199_s0 + $0x34] ss:$8 sps:$4 sm:$0xff]  }
   0xa   :  { %388 = vmatpush1.bf16.msra.mxu0 %v828_v3  ;;  %811 = vmatpush1.bf16.msra.mxu1 %v828_v3  ;;  %v856_v26 = vld [vmem:[%s1199_s0 + $0xc4] ss:$8 sps:$4 sm:$0xff]   ;;  %v859_v28 = vld [vmem:[%s1199_s0 + $0xc0] ss:$8 sps:$4 sm:$0xff]   ;;  %v862_v30 = vld [vmem:[%s1199_s0 + $0xd4] ss:$8 sps:$4 sm:$0xff]  }
   0xb   :  { %389 = vmatprep.subr.bf16.mxu0 %v902_v0  ;;  %796 = vmatprep.subr.bf16.mxu1 %v902_v0  ;;  %v864_v31 = vld [vmem:[%s1199_s0 + $0x30] ss:$8 sps:$4 sm:$0xff]   ;;  %v866_v33 = vld [vmem:[%s1199_s0 + $0x44] ss:$8 sps:$4 sm:$0xff]   ;;  %v870_v35 = vld [vmem:[%s1199_s0 + $0x40] ss:$8 sps:$4 sm:$0xff]  }
   0xc   :  { %v865_v32 = vld [vmem:[%s1199_s0 + $0xd0] ss:$8 sps:$4 sm:$0xff]   ;;  %v868_v34 = vld [vmem:[%s1199_s0 + $0xe4] ss:$8 sps:$4 sm:$0xff]   ;;  %v871_v36 = vld [vmem:[%s1199_s0 + $0xe0] ss:$8 sps:$4 sm:$0xff]  }
   0xd   :  { %v872_v37 = vld [vmem:[%s1199_s0 + $0x54] ss:$8 sps:$4 sm:$0xff]   ;;  %v876_v39 = vld [vmem:[%s1199_s0 + $0x50] ss:$8 sps:$4 sm:$0xff]   ;;  %v878_v41 = vld [vmem:[%s1199_s0 + $0x64] ss:$8 sps:$4 sm:$0xff]  }
   0xe   :  { %390 = vmatpush1.bf16.msra.mxu0 %v829_v4  ;;  %812 = vmatpush1.bf16.msra.mxu1 %v829_v4  ;;  %v874_v38 = vld [vmem:[%s1199_s0 + $0xf4] ss:$8 sps:$4 sm:$0xff]   ;;  %v877_v40 = vld [vmem:[%s1199_s0 + $0xf0] ss:$8 sps:$4 sm:$0xff]   ;;  %v880_v42 = vld [vmem:[%s1199_s0 + $0x104] ss:$8 sps:$4 sm:$0xff]  }
   0xf   :  { %391 = vmatprep.subr.bf16.mxu0 %v902_v0  ;;  %797 = vmatprep.subr.bf16.mxu1 %v902_v0  ;;  %v882_v43 = vld [vmem:[%s1199_s0 + $0x60] ss:$8 sps:$4 sm:$0xff]   ;;  %v884_v45 = vld [vmem:[%s1199_s0 + $0x74] ss:$8 sps:$4 sm:$0xff]   ;;  %v888_v47 = vld [vmem:[%s1199_s0 + $0x70] ss:$8 sps:$4 sm:$0xff]  }
  0x10   :  { %v883_v44 = vld [vmem:[%s1199_s0 + $0x100] ss:$8 sps:$4 sm:$0xff]   ;;  %v886_v46 = vld [vmem:[%s1199_s0 + $0x114] ss:$8 sps:$4 sm:$0xff]   ;;  %v889_v48 = vld [vmem:[%s1199_s0 + $0x110] ss:$8 sps:$4 sm:$0xff]  }
  0x11   :  { %v890_v49 = vld [vmem:[%s1199_s0 + $0x84] ss:$8 sps:$4 sm:$0xff]   ;;  %v894_v51 = vld [vmem:[%s1199_s0 + $0x80] ss:$8 sps:$4 sm:$0xff]   ;;  %v896_v53 = vld [vmem:[%s1199_s0 + $0x94] ss:$8 sps:$4 sm:$0xff]  }
  0x12   :  { %392 = vmatpush1.bf16.msra.mxu0 %v830_v5  ;;  %813 = vmatpush1.bf16.msra.mxu1 %v830_v5  ;;  %v892_v50 = vld [vmem:[%s1199_s0 + $0x124] ss:$8 sps:$4 sm:$0xff]   ;;  %v895_v52 = vld [vmem:[%s1199_s0 + $0x120] ss:$8 sps:$4 sm:$0xff]   ;;  %v898_v54 = vld [vmem:[%s1199_s0 + $0x134] ss:$8 sps:$4 sm:$0xff]  }
  0x13   :  { %393 = vmatprep.subr.bf16.mxu0 %v902_v0  ;;  %798 = vmatprep.subr.bf16.mxu1 %v902_v0  ;;  %v900_v55 = vld [vmem:[%s1199_s0 + $0x90] ss:$8 sps:$4 sm:$0xff]  }
  0x14   :  { %v901_v56 = vld [vmem:[%s1199_s0 + $0x130] ss:$8 sps:$4 sm:$0xff]  }
  0x16   :  { %394 = vmatpush1.bf16.msra.mxu0 %v831_v7  ;;  %814 = vmatpush1.bf16.msra.mxu1 %v831_v7 }
  0x17   :  { %395 = vmatprep.subr.bf16.mxu0 %v902_v0  ;;  %799 = vmatprep.subr.bf16.mxu1 %v902_v0 }
  0x1a   :  { %396 = vmatpush1.bf16.msra.mxu0 %v832_v9  ;;  %815 = vmatpush1.bf16.msra.mxu1 %v832_v9 }
  0x1b   :  { %397 = vmatprep.subr.bf16.mxu0 %v902_v0  ;;  %800 = vmatprep.subr.bf16.mxu1 %v902_v0 }
  0x1e   :  { %398 = vmatpush1.bf16.msra.mxu0 %v833_v10  ;;  %816 = vmatpush1.bf16.msra.mxu1 %v833_v10 }
  0x1f   :  { %399 = vmatprep.subr.bf16.mxu0 %v902_v0  ;;  %801 = vmatprep.subr.bf16.mxu1 %v902_v0 }
  0x22   :  { %400 = vmatpush1.bf16.msra.mxu0 %v834_v11  ;;  %817 = vmatpush1.bf16.msra.mxu1 %v834_v11 }
  0x23   :  { %401 = vmatprep.subr.bf16.mxu0 %v902_v0  ;;  %802 = vmatprep.subr.bf16.mxu1 %v902_v0 }
  0x26   :  { %402 = vmatpush1.bf16.msra.mxu0 %v835_v12  ;;  %818 = vmatpush1.bf16.msra.mxu1 %v835_v12 }
  0x27   :  { %403 = vmatprep.subr.bf16.mxu0 %v902_v0  ;;  %803 = vmatprep.subr.bf16.mxu1 %v902_v0 }
  0x2a   :  { %404 = vmatpush1.bf16.msra.mxu0 %v836_v13  ;;  %819 = vmatpush1.bf16.msra.mxu1 %v836_v13 }
  0x2b   :  { %405 = vmatprep.subr.bf16.mxu0 %v902_v0  ;;  %804 = vmatprep.subr.bf16.mxu1 %v902_v0 }
  0x2e   :  { %406 = vmatpush1.bf16.msra.mxu0 %v837_v14  ;;  %820 = vmatpush1.bf16.msra.mxu1 %v837_v14 }
  0x2f   :  { %407 = vmatprep.subr.bf16.mxu0 %v902_v0  ;;  %805 = vmatprep.subr.bf16.mxu1 %v902_v0 }
  0x32   :  { %408 = vmatpush1.bf16.msra.mxu0 %v838_v15  ;;  %821 = vmatpush1.bf16.msra.mxu1 %v838_v15 }
  0x33   :  { %409 = vmatprep.subr.bf16.mxu0 %v902_v0  ;;  %806 = vmatprep.subr.bf16.mxu1 %v902_v0 }
  0x36   :  { %410 = vmatpush1.bf16.msra.mxu0 %v839_v16  ;;  %822 = vmatpush1.bf16.msra.mxu1 %v839_v16 }
  0x37   :  { %411 = vmatprep.subr.bf16.mxu0 %v902_v0  ;;  %807 = vmatprep.subr.bf16.mxu1 %v902_v0 }
  0x3a   :  { %412 = vmatpush1.bf16.msra.mxu0 %v840_v17  ;;  %823 = vmatpush1.bf16.msra.mxu1 %v840_v17 }
  0x3b   :  { %413 = vmatprep.subr.bf16.mxu0 %v902_v0  ;;  %808 = vmatprep.subr.bf16.mxu1 %v902_v0 }
  0x3e   :  { %414 = vmatpush1.bf16.msra.mxu0 %v841_v18  ;;  %824 = vmatpush1.bf16.msra.mxu1 %v841_v18 }
  0x41   :  { %416 = vmatmul.mubr.bf16.vlgmr.msra.gmra.mrb[0].mxu0 %v842_v19  ;;  %496 = vmatmul.mubr.bf16.vlgmr.msra.gmra.mrb[0].mxu1 %v845_v20 }
  0x42   :  { %423 = vmatprep.mubr.bf16.mxu0 %v848_v21  ;;  %503 = vmatprep.mubr.bf16.mxu1 %v850_v22 }
  0x49   :  { %424 = vmatmul.mubr.bf16.gmra.mrb[4].mxu0 %v852_v23  ;;  %504 = vmatmul.mubr.bf16.gmra.mrb[4].mxu1 %v853_v24 }
  0x4a   :  { %431 = vmatprep.mubr.bf16.mxu0 %v854_v25  ;;  %511 = vmatprep.mubr.bf16.mxu1 %v856_v26 }
  0x51   :  { %432 = vmatmul.mubr.bf16.gmra.mrb[8].mxu0 %v858_v27  ;;  %512 = vmatmul.mubr.bf16.gmra.mrb[8].mxu1 %v859_v28 }
  0x52   :  { %439 = vmatprep.mubr.bf16.mxu0 %v860_v29  ;;  %519 = vmatprep.mubr.bf16.mxu1 %v862_v30 }
  0x59   :  { %440 = vmatmul.mubr.bf16.gmra.mrb[12].mxu0 %v864_v31  ;;  %520 = vmatmul.mubr.bf16.gmra.mrb[12].mxu1 %v865_v32 }
  0x5a   :  { %447 = vmatprep.mubr.bf16.mxu0 %v866_v33  ;;  %527 = vmatprep.mubr.bf16.mxu1 %v868_v34 }
  0x61   :  { %448 = vmatmul.mubr.bf16.gmra.mrb[16].mxu0 %v870_v35  ;;  %528 = vmatmul.mubr.bf16.gmra.mrb[16].mxu1 %v871_v36 }
  0x62   :  { %455 = vmatprep.mubr.bf16.mxu0 %v872_v37  ;;  %535 = vmatprep.mubr.bf16.mxu1 %v874_v38 }
  0x69   :  { %456 = vmatmul.mubr.bf16.gmra.mrb[20].mxu0 %v876_v39  ;;  %536 = vmatmul.mubr.bf16.gmra.mrb[20].mxu1 %v877_v40  ;;  %v1156_v39 = vld [vmem:[%s1200_s2] ss:$0 sm:$0xff] }
  0x6a   :  { %463 = vmatprep.mubr.bf16.mxu0 %v878_v41  ;;  %543 = vmatprep.mubr.bf16.mxu1 %v880_v42 }
  0x71   :  { %464 = vmatmul.mubr.bf16.gmra.mrb[24].mxu0 %v882_v43  ;;  %544 = vmatmul.mubr.bf16.gmra.mrb[24].mxu1 %v883_v44 }
  0x72   :  { %471 = vmatprep.mubr.bf16.mxu0 %v884_v45  ;;  %551 = vmatprep.mubr.bf16.mxu1 %v886_v46 }
  0x79   :  { %472 = vmatmul.mubr.bf16.gmra.mrb[28].mxu0 %v888_v47  ;;  %552 = vmatmul.mubr.bf16.gmra.mrb[28].mxu1 %v889_v48 }
  0x7a   :  { %479 = vmatprep.mubr.bf16.mxu0 %v890_v49  ;;  %559 = vmatprep.mubr.bf16.mxu1 %v892_v50 }
  0x81   :  { %480 = vmatmul.mubr.bf16.gmra.mrb[32].mxu0 %v894_v51  ;;  %560 = vmatmul.mubr.bf16.gmra.mrb[32].mxu1 %v895_v52 }
  0x82   :  { %487 = vmatprep.mubr.bf16.mxu0 %v896_v53  ;;  %567 = vmatprep.mubr.bf16.mxu1 %v898_v54 }
  0x89   :  { %488 = vmatmul.mubr.bf16.gmra.mrb[36].mxu0 %v900_v55  ;;  %568 = vmatmul.mubr.bf16.gmra.mrb[36].mxu1 %v901_v56 }
 0x114   :  { %v417_v57 = vpop.f32.mrb[0].mxu0  ;;  %v497_v58 = vpop.f32.mrb[0].mxu1 }
 0x115   :  { %v419_v59 = vpop.f32.mrb[1].mxu0  ;;  %v499_v60 = vpop.f32.mrb[1].mxu1 }
 0x116   :  { %v420_v61 = vpop.f32.mrb[2].mxu0  ;;  %v500_v62 = vpop.f32.mrb[2].mxu1 }
 0x117   :  { %v422_v63 = vpop.f32.mrb[3].mxu0  ;;  %v502_v0 = vpop.f32.mrb[3].mxu1 }
 0x11c   :  { %v1123_v1 = vpop.f32.mrb[4].mxu0  ;;  %v505_v2 = vpop.f32.mrb[4].mxu1 }
 0x11d   :  { %v427_v3 = vpop.f32.mrb[5].mxu0  ;;  %v507_v4 = vpop.f32.mrb[5].mxu1 }
 0x11e   :  { %v1125_v5 = vpop.f32.mrb[6].mxu0  ;;  %v1127_v6 = vpop.f32.mrb[6].mxu1 }
 0x11f   :  { %v430_v7 = vpop.f32.mrb[7].mxu0  ;;  %v510_v8 = vpop.f32.mrb[7].mxu1 }
 0x124   :  { %v1129_v9 = vpop.f32.mrb[8].mxu0  ;;  %v1131_v10 = vpop.f32.mrb[8].mxu1 }
 0x125   :  { %v435_v11 = vpop.f32.mrb[9].mxu0  ;;  %v515_v12 = vpop.f32.mrb[9].mxu1 }
 0x126   :  { %v1133_v13 = vpop.f32.mrb[10].mxu0  ;;  %v1135_v14 = vpop.f32.mrb[10].mxu1 }
 0x127   :  { %v438_v15 = vpop.f32.mrb[11].mxu0  ;;  %v518_v16 = vpop.f32.mrb[11].mxu1 }
 0x12c   :  { %v1137_v17 = vpop.f32.mrb[12].mxu0  ;;  %v1139_v18 = vpop.f32.mrb[12].mxu1 }
 0x12d   :  { %v443_v19 = vpop.f32.mrb[13].mxu0  ;;  %v523_v20 = vpop.f32.mrb[13].mxu1 }
 0x12e   :  { %v1141_v21 = vpop.f32.mrb[14].mxu0  ;;  %v1143_v22 = vpop.f32.mrb[14].mxu1 }
 0x12f   :  { %v446_v23 = vpop.f32.mrb[15].mxu0  ;;  %v526_v24 = vpop.f32.mrb[15].mxu1 }
 0x134   :  { %v1145_v25 = vpop.f32.mrb[16].mxu0  ;;  %v1147_v26 = vpop.f32.mrb[16].mxu1 }
 0x135   :  { %v451_v27 = vpop.f32.mrb[17].mxu0  ;;  %v531_v28 = vpop.f32.mrb[17].mxu1 }
 0x136   :  { %v1149_v29 = vpop.f32.mrb[18].mxu0  ;;  %v1151_v30 = vpop.f32.mrb[18].mxu1 }
 0x137   :  { %v454_v31 = vpop.f32.mrb[19].mxu0  ;;  %v534_v32 = vpop.f32.mrb[19].mxu1 }
 0x13c   :  { %v457_v33 = vpop.f32.mrb[20].mxu0  ;;  %v537_v34 = vpop.f32.mrb[20].mxu1 }
 0x13d   :  { %v576_v35 = vmax.f32 %v417_v57, %v457_v33  ;;  %v586_v36 = vmax.f32 %v497_v58, %v537_v34  ;;  %v459_v37 = vpop.f32.mrb[21].mxu0  ;;  %v539_v38 = vpop.f32.mrb[21].mxu1 }
 0x13e   :  { %v460_v40 = vpop.f32.mrb[22].mxu0  ;;  %v540_v41 = vpop.f32.mrb[22].mxu1 }
 0x13f   :  { %v596_v42 = vmax.f32 %v576_v35, %v586_v36  ;;  %v577_v43 = vmax.f32 %v420_v61, %v460_v40  ;;  %v587_v44 = vmax.f32 %v500_v62, %v540_v41  ;;  %v462_v45 = vpop.f32.mrb[23].mxu0  ;;  %v542_v46 = vpop.f32.mrb[23].mxu1 }
 0x141   :  { %v613_v47 = vadd.f32 %v1156_v39, %v596_v42  ;;  %v597_v48 = vmax.f32 %v577_v43, %v587_v44 }
 0x143   :  { %v614_v49 = vadd.f32 %v1156_v39, %v597_v48  ;;  %v623_v52 = vmax.f32 %v613_v47, 0.0 }
 0x144   :  { %v465_v50 = vpop.f32.mrb[24].mxu0  ;;  %v545_v51 = vpop.f32.mrb[24].mxu1 }
 0x145   :  { %v624_v53 = vmax.f32 %v614_v49, 0.0  ;;  %v578_v54 = vmax.f32 %v1123_v1, %v465_v50  ;;  %v588_v55 = vmax.f32 %v505_v2, %v545_v51  ;;  %v467_v56 = vpop.f32.mrb[25].mxu0  ;;  %v547_v57 = vpop.f32.mrb[25].mxu1 }
 0x146   :  { %v468_v58 = vpop.f32.mrb[26].mxu0  ;;  %v548_v59 = vpop.f32.mrb[26].mxu1 }
 0x147   :  { %v767_v60 = vpack.c.bf16 %v624_v53, %v623_v52  ;;  %v598_v61 = vmax.f32 %v578_v54, %v588_v55  ;;  %v579_v62 = vmax.f32 %v1125_v5, %v468_v58  ;;  %v589_v63 = vmax.f32 %v1127_v6, %v548_v59  ;;  %v470_v0 = vpop.f32.mrb[27].mxu0  ;;  %v550_v3 = vpop.f32.mrb[27].mxu1 }
 0x149   :  { %768 = vst [vmem:[%s1201_s3] sm:$0xff] %v767_v60   ;;  %v615_v4 = vadd.f32 %v1156_v39, %v598_v61  ;;  %v599_v1 = vmax.f32 %v579_v62, %v589_v63 }
 0x14b   :  { %v616_v2 = vadd.f32 %v1156_v39, %v599_v1  ;;  %v625_v11 = vmax.f32 %v615_v4, 0.0 }
 0x14c   :  { %v473_v7 = vpop.f32.mrb[28].mxu0  ;;  %v553_v8 = vpop.f32.mrb[28].mxu1 }
 0x14d   :  { %v626_v12 = vmax.f32 %v616_v2, 0.0  ;;  %v580_v15 = vmax.f32 %v1129_v9, %v473_v7  ;;  %v590_v5 = vmax.f32 %v1131_v10, %v553_v8  ;;  %v475_v6 = vpop.f32.mrb[29].mxu0  ;;  %v555_v16 = vpop.f32.mrb[29].mxu1 }
 0x14e   :  { %v476_v19 = vpop.f32.mrb[30].mxu0  ;;  %v556_v20 = vpop.f32.mrb[30].mxu1 }
 0x14f   :  { %v772_v23 = vpack.c.bf16 %v626_v12, %v625_v11  ;;  %v600_v24 = vmax.f32 %v580_v15, %v590_v5  ;;  %v581_v27 = vmax.f32 %v1133_v13, %v476_v19  ;;  %v591_v28 = vmax.f32 %v1135_v14, %v556_v20  ;;  %v478_v31 = vpop.f32.mrb[31].mxu0  ;;  %v558_v32 = vpop.f32.mrb[31].mxu1 }
 0x151   :  { %789 = vst [vmem:[%s1201_s3 + $0x8] sm:$0xff] %v772_v23   ;;  %v617_v9 = vadd.f32 %v1156_v39, %v600_v24  ;;  %v601_v33 = vmax.f32 %v581_v27, %v591_v28 }
 0x153   :  { %v618_v10 = vadd.f32 %v1156_v39, %v601_v33  ;;  %v627_v36 = vmax.f32 %v617_v9, 0.0 }
 0x154   :  { %v481_v34 = vpop.f32.mrb[32].mxu0  ;;  %v561_v35 = vpop.f32.mrb[32].mxu1 }
 0x155   :  { %v628_v37 = vmax.f32 %v618_v10, 0.0  ;;  %v582_v38 = vmax.f32 %v1137_v17, %v481_v34  ;;  %v592_v13 = vmax.f32 %v1139_v18, %v561_v35  ;;  %v483_v14 = vpop.f32.mrb[33].mxu0  ;;  %v563_v40 = vpop.f32.mrb[33].mxu1 }
 0x156   :  { %v484_v41 = vpop.f32.mrb[34].mxu0  ;;  %v564_v42 = vpop.f32.mrb[34].mxu1 }
 0x157   :  { %v777_v43 = vpack.c.bf16 %v628_v37, %v627_v36  ;;  %v602_v44 = vmax.f32 %v582_v38, %v592_v13  ;;  %v583_v45 = vmax.f32 %v1141_v21, %v484_v41  ;;  %v593_v46 = vmax.f32 %v1143_v22, %v564_v42  ;;  %v486_v47 = vpop.f32.mrb[35].mxu0  ;;  %v566_v48 = vpop.f32.mrb[35].mxu1 }
 0x159   :  { %790 = vst [vmem:[%s1201_s3 + $0x10] sm:$0xff] %v777_v43   ;;  %v619_v17 = vadd.f32 %v1156_v39, %v602_v44  ;;  %v603_v49 = vmax.f32 %v583_v45, %v593_v46 }
 0x15b   :  { %v620_v18 = vadd.f32 %v1156_v39, %v603_v49  ;;  %v629_v52 = vmax.f32 %v619_v17, 0.0 }
 0x15c   :  { %v489_v50 = vpop.f32.mrb[36].mxu0  ;;  %v569_v51 = vpop.f32.mrb[36].mxu1 }
 0x15d   :  { %v630_v53 = vmax.f32 %v620_v18, 0.0  ;;  %v584_v54 = vmax.f32 %v1145_v25, %v489_v50  ;;  %v594_v21 = vmax.f32 %v1147_v26, %v569_v51  ;;  %v491_v22 = vpop.f32.mrb[37].mxu0  ;;  %v571_v55 = vpop.f32.mrb[37].mxu1 }
 0x15e   :  { %v492_v56 = vpop.f32.mrb[38].mxu0  ;;  %v572_v57 = vpop.f32.mrb[38].mxu1 }
 0x15f   :  { %v782_v58 = vpack.c.bf16 %v630_v53, %v629_v52  ;;  %v604_v59 = vmax.f32 %v584_v54, %v594_v21  ;;  %v585_v60 = vmax.f32 %v1149_v29, %v492_v56  ;;  %v595_v61 = vmax.f32 %v1151_v30, %v572_v57  ;;  %v494_v62 = vpop.f32.mrb[39].mxu0  ;;  %v574_v63 = vpop.f32.mrb[39].mxu1 }
 0x161   :  { %791 = vst [vmem:[%s1201_s3 + $0x18] sm:$0xff] %v782_v58   ;;  %v621_v25 = vadd.f32 %v1156_v39, %v604_v59  ;;  %v605_v0 = vmax.f32 %v585_v60, %v595_v61 }
 0x163   :  { %v622_v26 = vadd.f32 %v1156_v39, %v605_v0  ;;  %v631_v3 = vmax.f32 %v621_v25, 0.0 }
 0x165   :  { %v632_v4 = vmax.f32 %v622_v26, 0.0 }
 0x167   :  { %v787_v1 = vpack.c.bf16 %v632_v4, %v631_v3 }
 0x169   :  { %792 = vst [vmem:[%s1201_s3 + $0x20] sm:$0xff] %v787_v1  }

// kernel: cnn_forward.5
= control target key start
LH: loop header
LB: loop body
LE: loop exit
PB: predicated region body
PF: predicated region fallthrough
CT: control target
= control target key end

     0   :  { %vm1601_vm0 = vmmov 0   ;;  %s1971_s1 = inlined_call_operand.vmem [shape: bf16[1536,128], index: 1, kind: input, shape index: {}]   ;;  %s1972_s0 = inlined_call_operand.vmem [shape: bf16[8,1536], index: 0, kind: input, shape index: {}]   ;;  %s1973_s3 = inlined_call_operand.vmem [shape: bf16[128,128], index: 3, kind: input, shape index: {}]   ;;  %s1974_s2 = inlined_call_operand.vmem [shape: f32[1,128], index: 2, kind: input, shape index: {}]   ;;  %s1975_s4 = inlined_call_operand.vmem [shape: f32[1,128], index: 4, kind: input, shape index: {}]   ;;  %s1976_s5 = inlined_call_operand.vmem [shape: f32[8,128], index: 5, kind: output, shape index: {}]  }
   0x1   :  { %v1484_v0 = vld [vmem:[%s1971_s1 + $0x40] sm:$0xff]   ;;  %v1488_v4 = vld [vmem:[%s1971_s1 + $0x48] sm:$0xff]   ;;  %v1492_v8 = vld [vmem:[%s1971_s1 + $0x50] sm:$0xff]  }
   0x2   :  { %v1485_v1 = vld [vmem:[%s1971_s1 + $0xc0] sm:$0xff]   ;;  %1321 = vmatprep.subr.bf16.mxu0 %v1484_v0  ;;  %v1489_v5 = vld [vmem:[%s1971_s1 + $0xc8] sm:$0xff]   ;;  %v1493_v9 = vld [vmem:[%s1971_s1 + $0xd0] sm:$0xff]  }
   0x3   :  { %v1486_v2 = vld [vmem:[%s1971_s1] sm:$0xff]   ;;  %1343 = vmatprep.subr.bf16.mxu1 %v1485_v1  ;;  %v1490_v6 = vld [vmem:[%s1971_s1 + $0x8] sm:$0xff]   ;;  %v1494_v10 = vld [vmem:[%s1971_s1 + $0x10] sm:$0xff]  }
   0x4   :  { %v1487_v3 = vld [vmem:[%s1971_s1 + $0x80] sm:$0xff]   ;;  %1322 = vmatpush3.bf16.msra.mxu0 %v1486_v2  ;;  %v1491_v7 = vld [vmem:[%s1971_s1 + $0x88] sm:$0xff]   ;;  %v1495_v11 = vld [vmem:[%s1971_s1 + $0x90] sm:$0xff]  }
   0x5   :  { %1344 = vmatpush3.bf16.msra.mxu1 %v1487_v3  ;;  %1323 = vmatprep.subr.bf16.mxu0 %v1488_v4  ;;  %v1496_v12 = vld [vmem:[%s1971_s1 + $0x58] sm:$0xff]   ;;  %v1500_v16 = vld [vmem:[%s1971_s1 + $0x60] sm:$0xff]   ;;  %v1504_v20 = vld [vmem:[%s1971_s1 + $0x68] sm:$0xff]  }
   0x6   :  { %1345 = vmatprep.subr.bf16.mxu1 %v1489_v5  ;;  %v1497_v13 = vld [vmem:[%s1971_s1 + $0xd8] sm:$0xff]   ;;  %v1501_v17 = vld [vmem:[%s1971_s1 + $0xe0] sm:$0xff]   ;;  %v1505_v21 = vld [vmem:[%s1971_s1 + $0xe8] sm:$0xff]  }
   0x7   :  { %v1498_v14 = vld [vmem:[%s1971_s1 + $0x18] sm:$0xff]   ;;  %v1502_v18 = vld [vmem:[%s1971_s1 + $0x20] sm:$0xff]   ;;  %v1506_v22 = vld [vmem:[%s1971_s1 + $0x28] sm:$0xff]  }
   0x8   :  { %1324 = vmatpush3.bf16.msra.mxu0 %v1490_v6  ;;  %v1499_v15 = vld [vmem:[%s1971_s1 + $0x98] sm:$0xff]   ;;  %v1503_v19 = vld [vmem:[%s1971_s1 + $0xa0] sm:$0xff]   ;;  %v1507_v23 = vld [vmem:[%s1971_s1 + $0xa8] sm:$0xff]  }
   0x9   :  { %1346 = vmatpush3.bf16.msra.mxu1 %v1491_v7  ;;  %1325 = vmatprep.subr.bf16.mxu0 %v1492_v8  ;;  %v1508_v24 = vld [vmem:[%s1971_s1 + $0x70] sm:$0xff]   ;;  %v1512_v28 = vld [vmem:[%s1971_s1 + $0x78] sm:$0xff]   ;;  %v21_v32 = vld [vmem:[%s1972_s0] sm:$0xff] }
   0xa   :  { %1347 = vmatprep.subr.bf16.mxu1 %v1493_v9  ;;  %v1509_v25 = vld [vmem:[%s1971_s1 + $0xf0] sm:$0xff]   ;;  %v1513_v29 = vld [vmem:[%s1971_s1 + $0xf8] sm:$0xff]   ;;  %v22_v33 = vld [vmem:[%s1972_s0 + $0x8] sm:$0xff]  ;;  %v1204_v34 = vcombine.low %v21_v32, %v21_v32  ;;  %v1205_v35 = vcombine.high %v21_v32, %v21_v32 }
   0xb   :  { %v1510_v26 = vld [vmem:[%s1971_s1 + $0x30] sm:$0xff]   ;;  %v1514_v30 = vld [vmem:[%s1971_s1 + $0x38] sm:$0xff]   ;;  %v1206_v36 = vcombine.low %v22_v33, %v22_v33  ;;  %v1207_v37 = vcombine.high %v22_v33, %v22_v33  ;;  %v1520_v38 = vld [vmem:[%s1971_s1 + $0x140] sm:$0xff]  }
   0xc   :  { %1326 = vmatpush3.bf16.msra.mxu0 %v1494_v10  ;;  %v1511_v27 = vld [vmem:[%s1971_s1 + $0xb0] sm:$0xff]   ;;  %v1515_v31 = vld [vmem:[%s1971_s1 + $0xb8] sm:$0xff]   ;;  %v1521_v39 = vld [vmem:[%s1971_s1 + $0x1c0] sm:$0xff]   ;;  %876 = vmatprep.mubr.bf16.mxu0 %v1205_v35 }
   0xd   :  { %1348 = vmatpush3.bf16.msra.mxu1 %v1495_v11  ;;  %1327 = vmatprep.subr.bf16.mxu0 %v1496_v12  ;;  %v1522_v40 = vld [vmem:[%s1971_s1 + $0x100] sm:$0xff]   ;;  %v1524_v42 = vld [vmem:[%s1971_s1 + $0x148] sm:$0xff]   ;;  %v1528_v46 = vld [vmem:[%s1971_s1 + $0x150] sm:$0xff]  }
   0xe   :  { %1349 = vmatprep.subr.bf16.mxu1 %v1497_v13  ;;  %916 = vmatprep.mubr.bf16.mxu1 %v1207_v37  ;;  %v1523_v41 = vld [vmem:[%s1971_s1 + $0x180] sm:$0xff]   ;;  %v1525_v43 = vld [vmem:[%s1971_s1 + $0x1c8] sm:$0xff]   ;;  %v1529_v47 = vld [vmem:[%s1971_s1 + $0x1d0] sm:$0xff]  }
   0xf   :  { %v1526_v44 = vld [vmem:[%s1971_s1 + $0x108] sm:$0xff]   ;;  %v1530_v48 = vld [vmem:[%s1971_s1 + $0x110] sm:$0xff]   ;;  %v1532_v50 = vld [vmem:[%s1971_s1 + $0x158] sm:$0xff]  }
  0x10   :  { %1328 = vmatpush3.bf16.msra.mxu0 %v1498_v14  ;;  %v1527_v45 = vld [vmem:[%s1971_s1 + $0x188] sm:$0xff]   ;;  %v1531_v49 = vld [vmem:[%s1971_s1 + $0x190] sm:$0xff]   ;;  %v1533_v51 = vld [vmem:[%s1971_s1 + $0x1d8] sm:$0xff]  }
  0x11   :  { %1350 = vmatpush3.bf16.msra.mxu1 %v1499_v15  ;;  %1329 = vmatprep.subr.bf16.mxu0 %v1500_v16  ;;  %v1534_v52 = vld [vmem:[%s1971_s1 + $0x118] sm:$0xff]   ;;  %v1536_v54 = vld [vmem:[%s1971_s1 + $0x160] sm:$0xff]   ;;  %v1540_v58 = vld [vmem:[%s1971_s1 + $0x168] sm:$0xff]  }
  0x12   :  { %1351 = vmatprep.subr.bf16.mxu1 %v1501_v17  ;;  %v1535_v53 = vld [vmem:[%s1971_s1 + $0x198] sm:$0xff]   ;;  %v1537_v55 = vld [vmem:[%s1971_s1 + $0x1e0] sm:$0xff]   ;;  %v1541_v59 = vld [vmem:[%s1971_s1 + $0x1e8] sm:$0xff]  }
  0x13   :  { %v1538_v56 = vld [vmem:[%s1971_s1 + $0x120] sm:$0xff]   ;;  %v1542_v60 = vld [vmem:[%s1971_s1 + $0x128] sm:$0xff]   ;;  %v1544_v62 = vld [vmem:[%s1971_s1 + $0x170] sm:$0xff]  }
  0x14   :  { %1330 = vmatpush3.bf16.msra.mxu0 %v1502_v18  ;;  %v1539_v57 = vld [vmem:[%s1971_s1 + $0x1a0] sm:$0xff]   ;;  %v1543_v61 = vld [vmem:[%s1971_s1 + $0x1a8] sm:$0xff]   ;;  %v1545_v63 = vld [vmem:[%s1971_s1 + $0x1f0] sm:$0xff]  }
  0x15   :  { %1352 = vmatpush3.bf16.msra.mxu1 %v1503_v19  ;;  %1331 = vmatprep.subr.bf16.mxu0 %v1504_v20  ;;  %v1546_v0 = vld [vmem:[%s1971_s1 + $0x130] sm:$0xff]   ;;  %v1548_v2 = vld [vmem:[%s1971_s1 + $0x178] sm:$0xff]   ;;  %v1556_v12 = vld [vmem:[%s1971_s1 + $0x240] sm:$0xff]  }
  0x16   :  { %1353 = vmatprep.subr.bf16.mxu1 %v1505_v21  ;;  %v1547_v1 = vld [vmem:[%s1971_s1 + $0x1b0] sm:$0xff]   ;;  %v1549_v3 = vld [vmem:[%s1971_s1 + $0x1f8] sm:$0xff]   ;;  %v1557_v13 = vld [vmem:[%s1971_s1 + $0x2c0] sm:$0xff]  }
  0x17   :  { %v1550_v4 = vld [vmem:[%s1971_s1 + $0x138] sm:$0xff]   ;;  %v23_v6 = vld [vmem:[%s1972_s0 + $0x10] sm:$0xff]  ;;  %v1558_v14 = vld [vmem:[%s1971_s1 + $0x200] sm:$0xff]  }
  0x18   :  { %1332 = vmatpush3.bf16.msra.mxu0 %v1506_v22  ;;  %v1551_v5 = vld [vmem:[%s1971_s1 + $0x1b8] sm:$0xff]   ;;  %v1208_v7 = vcombine.low %v23_v6, %v23_v6  ;;  %v1209_v8 = vcombine.high %v23_v6, %v23_v6  ;;  %v1559_v15 = vld [vmem:[%s1971_s1 + $0x280] sm:$0xff]   ;;  %v1560_v16 = vld [vmem:[%s1971_s1 + $0x248] sm:$0xff]  }
  0x19   :  { %1354 = vmatpush3.bf16.msra.mxu1 %v1507_v23  ;;  %1333 = vmatprep.subr.bf16.mxu0 %v1508_v24  ;;  %v24_v9 = vld [vmem:[%s1972_s0 + $0x18] sm:$0xff]  ;;  %v1561_v17 = vld [vmem:[%s1971_s1 + $0x2c8] sm:$0xff]   ;;  %v1564_v20 = vld [vmem:[%s1971_s1 + $0x250] sm:$0xff]  }
  0x1a   :  { %1355 = vmatprep.subr.bf16.mxu1 %v1509_v25  ;;  %v1210_v10 = vcombine.low %v24_v9, %v24_v9  ;;  %v1211_v11 = vcombine.high %v24_v9, %v24_v9  ;;  %v1562_v18 = vld [vmem:[%s1971_s1 + $0x208] sm:$0xff]   ;;  %v1565_v21 = vld [vmem:[%s1971_s1 + $0x2d0] sm:$0xff]   ;;  %v1568_v24 = vld [vmem:[%s1971_s1 + $0x258] sm:$0xff]  }
  0x1b   :  { %v1563_v19 = vld [vmem:[%s1971_s1 + $0x288] sm:$0xff]   ;;  %v1566_v22 = vld [vmem:[%s1971_s1 + $0x210] sm:$0xff]   ;;  %v1569_v25 = vld [vmem:[%s1971_s1 + $0x2d8] sm:$0xff]  }
  0x1c   :  { %1334 = vmatpush3.bf16.msra.mxu0 %v1510_v26  ;;  %v1567_v23 = vld [vmem:[%s1971_s1 + $0x290] sm:$0xff]   ;;  %v1570_v26 = vld [vmem:[%s1971_s1 + $0x218] sm:$0xff]   ;;  %v1576_v32 = vld [vmem:[%s1971_s1 + $0x268] sm:$0xff]  }
  0x1d   :  { %1356 = vmatpush3.bf16.msra.mxu1 %v1511_v27  ;;  %1335 = vmatprep.subr.bf16.mxu0 %v1512_v28  ;;  %v1571_v27 = vld [vmem:[%s1971_s1 + $0x298] sm:$0xff]   ;;  %v1572_v28 = vld [vmem:[%s1971_s1 + $0x260] sm:$0xff]   ;;  %v1577_v33 = vld [vmem:[%s1971_s1 + $0x2e8] sm:$0xff]  }
  0x1e   :  { %1357 = vmatprep.subr.bf16.mxu1 %v1513_v29  ;;  %v1573_v29 = vld [vmem:[%s1971_s1 + $0x2e0] sm:$0xff]   ;;  %v1579_v35 = vld [vmem:[%s1971_s1 + $0x2a8] sm:$0xff]   ;;  %v1581_v37 = vld [vmem:[%s1971_s1 + $0x2f0] sm:$0xff]  }
  0x20   :  { %1336 = vmatpush3.bf16.msra.mxu0 %v1514_v30  ;;  %v1574_v30 = vld [vmem:[%s1971_s1 + $0x220] sm:$0xff]  }
  0x21   :  { %1358 = vmatpush3.bf16.msra.mxu1 %v1515_v31  ;;  %1365 = vmatprep.subr.bf16.mxu0 %v1520_v38  ;;  %v1575_v31 = vld [vmem:[%s1971_s1 + $0x2a0] sm:$0xff]   ;;  %v1582_v38 = vld [vmem:[%s1971_s1 + $0x230] sm:$0xff]  }
  0x22   :  { %1387 = vmatprep.subr.bf16.mxu1 %v1521_v39  ;;  %v1583_v39 = vld [vmem:[%s1971_s1 + $0x2b0] sm:$0xff]  }
  0x23   :  { %877 = vmatmul.mubr.bf16.vlgmr.msra.gmra.mrb[0].mxu0 %v1204_v34  ;;  %v1578_v34 = vld [vmem:[%s1971_s1 + $0x228] sm:$0xff]  }
  0x24   :  { %917 = vmatmul.mubr.bf16.vlgmr.msra.gmra.mrb[0].mxu1 %v1206_v36  ;;  %1366 = vmatpush3.bf16.msra.mxu0 %v1522_v40  ;;  %v1580_v36 = vld [vmem:[%s1971_s1 + $0x270] sm:$0xff]   ;;  %v1584_v40 = vld [vmem:[%s1971_s1 + $0x278] sm:$0xff]  }
  0x25   :  { %1388 = vmatpush3.bf16.msra.mxu1 %v1523_v41  ;;  %1367 = vmatprep.subr.bf16.mxu0 %v1524_v42  ;;  %v1585_v41 = vld [vmem:[%s1971_s1 + $0x2f8] sm:$0xff]  }
  0x26   :  { %1389 = vmatprep.subr.bf16.mxu1 %v1525_v43  ;;  %956 = vmatprep.mubr.bf16.mxu0 %v1209_v8  ;;  %v1586_v42 = vld [vmem:[%s1971_s1 + $0x238] sm:$0xff]  }
  0x27   :  { %996 = vmatprep.mubr.bf16.mxu1 %v1211_v11  ;;  %v1587_v43 = vld [vmem:[%s1971_s1 + $0x2b8] sm:$0xff]  }
  0x28   :  { %1368 = vmatpush3.bf16.msra.mxu0 %v1526_v44  ;;  %v25_v44 = vld [vmem:[%s1972_s0 + $0x20] sm:$0xff] }
  0x29   :  { %1390 = vmatpush3.bf16.msra.mxu1 %v1527_v45  ;;  %1369 = vmatprep.subr.bf16.mxu0 %v1528_v46  ;;  %v26_v45 = vld [vmem:[%s1972_s0 + $0x28] sm:$0xff]  ;;  %v1212_v46 = vcombine.low %v25_v44, %v25_v44 }
  0x2a   :  { %1391 = vmatprep.subr.bf16.mxu1 %v1529_v47  ;;  %v1213_v47 = vcombine.high %v25_v44, %v25_v44 }
  0x2c   :  { %1370 = vmatpush3.bf16.msra.mxu0 %v1530_v48  ;;  %v1214_v48 = vcombine.low %v26_v45, %v26_v45 }
  0x2d   :  { %1392 = vmatpush3.bf16.msra.mxu1 %v1531_v49  ;;  %1371 = vmatprep.subr.bf16.mxu0 %v1532_v50  ;;  %v1215_v49 = vcombine.high %v26_v45, %v26_v45  ;;  %v1600_v50 = vmov 0.0  }
  0x2e   :  { %1393 = vmatprep.subr.bf16.mxu1 %v1533_v51  ;;  %v1592_v51 = vld [vmem:[%s1973_s3] sm:$0xff]  }
  0x30   :  { %1372 = vmatpush3.bf16.msra.mxu0 %v1534_v52  ;;  %v1593_v52 = vld [vmem:[%s1973_s3 + $0x8] sm:$0xff]  }
  0x31   :  { %1394 = vmatpush3.bf16.msra.mxu1 %v1535_v53  ;;  %1373 = vmatprep.subr.bf16.mxu0 %v1536_v54  ;;  %v1594_v53 = vld [vmem:[%s1973_s3 + $0x10] sm:$0xff]   ;;  %v1595_v54 = vld [vmem:[%s1973_s3 + $0x18] sm:$0xff]  }
  0x32   :  { %1395 = vmatprep.subr.bf16.mxu1 %v1537_v55  ;;  %v1596_v55 = vld [vmem:[%s1973_s3 + $0x20] sm:$0xff]  }
  0x34   :  { %1374 = vmatpush3.bf16.msra.mxu0 %v1538_v56  ;;  %v1597_v56 = vld [vmem:[%s1973_s3 + $0x28] sm:$0xff]  }
  0x35   :  { %1396 = vmatpush3.bf16.msra.mxu1 %v1539_v57  ;;  %1375 = vmatprep.subr.bf16.mxu0 %v1540_v58  ;;  %v1598_v57 = vld [vmem:[%s1973_s3 + $0x30] sm:$0xff]   ;;  %v1599_v58 = vld [vmem:[%s1973_s3 + $0x38] sm:$0xff]  }
  0x36   :  { %1397 = vmatprep.subr.bf16.mxu1 %v1541_v59 }
  0x38   :  { %1376 = vmatpush3.bf16.msra.mxu0 %v1542_v60 }
  0x39   :  { %1398 = vmatpush3.bf16.msra.mxu1 %v1543_v61  ;;  %1377 = vmatprep.subr.bf16.mxu0 %v1544_v62  ;;  %v1203_v61 = vld [vmem:[%s1974_s2] ss:$0 sm:$0xff] }
  0x3a   :  { %1399 = vmatprep.subr.bf16.mxu1 %v1545_v63 }
  0x3c   :  { %1378 = vmatpush3.bf16.msra.mxu0 %v1546_v0 }
  0x3d   :  { %1400 = vmatpush3.bf16.msra.mxu1 %v1547_v1  ;;  %1379 = vmatprep.subr.bf16.mxu0 %v1548_v2 }
  0x3e   :  { %1401 = vmatprep.subr.bf16.mxu1 %v1549_v3 }
  0x40   :  { %1380 = vmatpush3.bf16.msra.mxu0 %v1550_v4 }
  0x41   :  { %1402 = vmatpush3.bf16.msra.mxu1 %v1551_v5  ;;  %1409 = vmatprep.subr.bf16.mxu0 %v1556_v12 }
  0x42   :  { %1431 = vmatprep.subr.bf16.mxu1 %v1557_v13 }
  0x43   :  { %957 = vmatmul.mubr.bf16.vlgmr.msra.gmra.mrb[4].mxu0 %v1208_v7 }
  0x44   :  { %997 = vmatmul.mubr.bf16.vlgmr.msra.gmra.mrb[4].mxu1 %v1210_v10  ;;  %1410 = vmatpush3.bf16.msra.mxu0 %v1558_v14 }
  0x45   :  { %1432 = vmatpush3.bf16.msra.mxu1 %v1559_v15  ;;  %1411 = vmatprep.subr.bf16.mxu0 %v1560_v16 }
  0x46   :  { %1433 = vmatprep.subr.bf16.mxu1 %v1561_v17  ;;  %1036 = vmatprep.mubr.bf16.mxu0 %v1213_v47 }
  0x47   :  { %1076 = vmatprep.mubr.bf16.mxu1 %v1215_v49 }
  0x48   :  { %1412 = vmatpush3.bf16.msra.mxu0 %v1562_v18 }
  0x49   :  { %1434 = vmatpush3.bf16.msra.mxu1 %v1563_v19  ;;  %1413 = vmatprep.subr.bf16.mxu0 %v1564_v20 }
  0x4a   :  { %1435 = vmatprep.subr.bf16.mxu1 %v1565_v21 }
  0x4c   :  { %1414 = vmatpush3.bf16.msra.mxu0 %v1566_v22 }
  0x4d   :  { %1436 = vmatpush3.bf16.msra.mxu1 %v1567_v23  ;;  %1415 = vmatprep.subr.bf16.mxu0 %v1568_v24 }
  0x4e   :  { %1437 = vmatprep.subr.bf16.mxu1 %v1569_v25 }
  0x50   :  { %1416 = vmatpush3.bf16.msra.mxu0 %v1570_v26 }
  0x51   :  { %1438 = vmatpush3.bf16.msra.mxu1 %v1571_v27  ;;  %1417 = vmatprep.subr.bf16.mxu0 %v1572_v28 }
  0x52   :  { %1439 = vmatprep.subr.bf16.mxu1 %v1573_v29 }
  0x54   :  { %1418 = vmatpush3.bf16.msra.mxu0 %v1574_v30 }
  0x55   :  { %1440 = vmatpush3.bf16.msra.mxu1 %v1575_v31  ;;  %1419 = vmatprep.subr.bf16.mxu0 %v1576_v32 }
  0x56   :  { %1441 = vmatprep.subr.bf16.mxu1 %v1577_v33 }
  0x58   :  { %1420 = vmatpush3.bf16.msra.mxu0 %v1578_v34  ;;  %v1312_v34 = vld [vmem:[%s1975_s4] ss:$0 sm:$0xff] }
  0x59   :  { %1442 = vmatpush3.bf16.msra.mxu1 %v1579_v35  ;;  %1421 = vmatprep.subr.bf16.mxu0 %v1580_v36 }
  0x5a   :  { %1443 = vmatprep.subr.bf16.mxu1 %v1581_v37 }
  0x5c   :  { %1422 = vmatpush3.bf16.msra.mxu0 %v1582_v38 }
  0x5d   :  { %1444 = vmatpush3.bf16.msra.mxu1 %v1583_v39  ;;  %1423 = vmatprep.subr.bf16.mxu0 %v1584_v40 }
  0x5e   :  { %1445 = vmatprep.subr.bf16.mxu1 %v1585_v41 }
  0x60   :  { %1424 = vmatpush3.bf16.msra.mxu0 %v1586_v42 }
  0x61   :  { %1446 = vmatpush3.bf16.msra.mxu1 %v1587_v43  ;;  %1462 = vmatprep.subr.bf16.mxu0 %v1600_v50 }
  0x63   :  { %1037 = vmatmul.mubr.bf16.vlgmr.msra.gmra.mrb[8].mxu0 %v1212_v46 }
  0x64   :  { %1077 = vmatmul.mubr.bf16.vlgmr.msra.gmra.mrb[8].mxu1 %v1214_v48  ;;  %1463 = vmatpush3.bf16.msra.mxu0 %v1592_v51 }
  0x65   :  { %1464 = vmatprep.subr.bf16.mxu0 %v1600_v50  ;;  %1478 = vmatprep.mubr.msk.bf16.mxu0 %vm1601_vm0, %v1600_v50 }
  0x68   :  { %1465 = vmatpush3.bf16.msra.mxu0 %v1593_v52 }
  0x69   :  { %1466 = vmatprep.subr.bf16.mxu0 %v1600_v50 }
  0x6c   :  { %1467 = vmatpush3.bf16.msra.mxu0 %v1594_v53 }
  0x6d   :  { %1468 = vmatprep.subr.bf16.mxu0 %v1600_v50 }
  0x70   :  { %1469 = vmatpush3.bf16.msra.mxu0 %v1595_v54 }
  0x71   :  { %1470 = vmatprep.subr.bf16.mxu0 %v1600_v50 }
  0x74   :  { %1471 = vmatpush3.bf16.msra.mxu0 %v1596_v55 }
  0x75   :  { %1472 = vmatprep.subr.bf16.mxu0 %v1600_v50 }
  0x78   :  { %1473 = vmatpush3.bf16.msra.mxu0 %v1597_v56 }
  0x79   :  { %1474 = vmatprep.subr.bf16.mxu0 %v1600_v50 }
  0x7c   :  { %1475 = vmatpush3.bf16.msra.mxu0 %v1598_v57 }
  0x7d   :  { %1476 = vmatprep.subr.bf16.mxu0 %v1600_v50 }
  0x80   :  { %1477 = vmatpush3.bf16.msra.mxu0 %v1599_v58 }
  0xf6   :  { %v1337_v59 = vpop.f32.mrb[0].mxu0 }
  0xf7   :  { %v1359_v60 = vpop.f32.mrb[0].mxu1  ;;  %v1338_v62 = vpop.f32.mrb[1].mxu0 }
  0xf8   :  { %v1360_v63 = vpop.f32.mrb[1].mxu1  ;;  %v1339_v0 = vadd.f32 %v1338_v62, %v1337_v59  ;;  %v1340_v2 = vpop.f32.mrb[2].mxu0 }
  0xf9   :  { %v1361_v1 = vadd.f32 %v1360_v63, %v1359_v60  ;;  %v1362_v3 = vpop.f32.mrb[2].mxu1  ;;  %v1341_v4 = vpop.f32.mrb[3].mxu0 }
  0xfa   :  { %v1363_v5 = vpop.f32.mrb[3].mxu1  ;;  %v879_v6 = vadd.f32 %v1339_v0, %v1203_v61 }
  0xfc   :  { %v919_v7 = vadd.f32 %v1361_v1, %v879_v6 }
 0x116   :  { %v1381_v8 = vpop.f32.mrb[4].mxu0 }
 0x117   :  { %v1403_v9 = vpop.f32.mrb[4].mxu1  ;;  %v1382_v10 = vpop.f32.mrb[5].mxu0 }
 0x118   :  { %v1404_v11 = vpop.f32.mrb[5].mxu1  ;;  %v1383_v12 = vadd.f32 %v1382_v10, %v1381_v8  ;;  %v1384_v14 = vpop.f32.mrb[6].mxu0 }
 0x119   :  { %v1405_v13 = vadd.f32 %v1404_v11, %v1403_v9  ;;  %v1406_v15 = vpop.f32.mrb[6].mxu1  ;;  %v1385_v16 = vpop.f32.mrb[7].mxu0 }
 0x11a   :  { %v1407_v17 = vpop.f32.mrb[7].mxu1  ;;  %v959_v18 = vadd.f32 %v1383_v12, %v919_v7 }
 0x11c   :  { %v999_v19 = vadd.f32 %v1405_v13, %v959_v18 }
 0x136   :  { %v1425_v20 = vpop.f32.mrb[8].mxu0 }
 0x137   :  { %v1447_v21 = vpop.f32.mrb[8].mxu1  ;;  %v1426_v22 = vpop.f32.mrb[9].mxu0 }
 0x138   :  { %v1427_v23 = vadd.f32 %v1426_v22, %v1425_v20  ;;  %v1448_v24 = vpop.f32.mrb[9].mxu1  ;;  %v1428_v25 = vpop.f32.mrb[10].mxu0 }
 0x139   :  { %v1449_v26 = vadd.f32 %v1448_v24, %v1447_v21  ;;  %v1450_v27 = vpop.f32.mrb[10].mxu1  ;;  %v1429_v28 = vpop.f32.mrb[11].mxu0 }
 0x13a   :  { %v1039_v29 = vadd.f32 %v1427_v23, %v999_v19  ;;  %v1451_v30 = vpop.f32.mrb[11].mxu1 }
 0x13c   :  { %v1079_v31 = vadd.f32 %v1449_v26, %v1039_v29 }
 0x13e   :  { %v1084_v32 = vmax.f32 %v1079_v31, 0.0 }
 0x140   :  { %v1085_v33 = vpack.c.bf16 %v1084_v32, %v1084_v32 }
 0x142   :  { %1479 = vmatmul.mubr.bf16.vlgmr.msra.gmra.mrb[12].mxu0 %v1085_v33 }
 0x215   :  { %v1191_v35 = vpop.f32.mrb[12].mxu0 }
 0x216   :  { %v1192_v36 = vadd.f32 %v1312_v34, %v1191_v35  ;;  %v1480_v37 = vpop.f32.mrb[13].mxu0 }
 0x217   :  { %v1194_v38 = vpop.f32.mrb[14].mxu0 }
 0x218   :  { %v1197_v39 = vmax.f32 %v1192_v36, 0.0  ;;  %v1481_v40 = vpop.f32.mrb[15].mxu0 }
 0x21a   :  { %1198 = vst [vmem:[%s1976_s5] sm:$0xff] %v1197_v39 }

</bundles_post_ra>
